<compile_context>
chip_gen: v7x
topology: tpu7x:2x2x1
jax: 0.10.0
libtpu: 0.0.40
codegen_flags: <defaults>
</compile_context>

<pallas_src>
import functools

import jax
import jax.numpy as jnp
from jax.experimental import pallas as pl
from jax.experimental.pallas import tpu as pltpu


def _round_up(v, m):
    return (v + m - 1) // m * m


def _device_kind():
    try:
        return jax.devices()[0].device_kind.lower()
    except Exception:
        return ""


def _elementwise_dtype():
    kind = _device_kind()
    # bf16 VALUs exist on v6e / v7x; on v5e (and older) the compiler would
    # insert converts, so keep the elementwise math in f32 there.
    if ("v6" in kind) or ("v7" in kind) or ("7x" in kind):
        return jnp.bfloat16
    return jnp.float32


def _vmem_limit_bytes():
    kind = _device_kind()
    if ("v5" in kind) or ("v6" in kind):
        return 100 * 1024 * 1024      # 128 MiB physical: allow big blocks
    return 48 * 1024 * 1024           # v7x: 64 MiB / core -> stay safe


def _pick_row_tile(H):
    for th in (8, 16, 4, 2):
        if H % th == 0:
            return th
    return H


def init_params(key, in_channels, growth_rate):
    """Raw module parameters: conv weights + eval-mode BN folded scale/bias."""
    inner = 4 * growth_rate
    keys = jax.random.split(key, 10)
    # PyTorch conv weights are (out, in, kh, kw); stored matmul-friendly:
    #   w1 -> (Cin, inner), w2 -> (3, 3, inner, growth)   (HWIO)
    w1 = 0.1 * jax.random.normal(keys[0], (in_channels, inner), jnp.float32)
    w2 = 0.1 * jax.random.normal(keys[1], (3, 3, inner, growth_rate), jnp.float32)

    eps = 1e-5
    # Non-trivial (but positive-gamma) BN params so the BN fold is exercised.
    gamma1 = 0.5 + jax.random.uniform(keys[2], (in_channels,), jnp.float32)
    beta1 = 0.1 * jax.random.normal(keys[3], (in_channels,), jnp.float32)
    mean1 = 0.1 * jax.random.normal(keys[4], (in_channels,), jnp.float32)
    var1 = 0.5 + jax.random.uniform(keys[5], (in_channels,), jnp.float32)
    s1 = (gamma1 / jnp.sqrt(var1 + eps)).reshape(1, in_channels)
    b1 = (beta1 - mean1 * gamma1 / jnp.sqrt(var1 + eps)).reshape(1, in_channels)

    gamma2 = 0.5 + jax.random.uniform(keys[6], (inner,), jnp.float32)
    beta2 = 0.1 * jax.random.normal(keys[7], (inner,), jnp.float32)
    mean2 = 0.1 * jax.random.normal(keys[8], (inner,), jnp.float32)
    var2 = 0.5 + jax.random.uniform(keys[9], (inner,), jnp.float32)
    s2 = (gamma2 / jnp.sqrt(var2 + eps)).reshape(1, inner)
    b2 = (beta2 - mean2 * gamma2 / jnp.sqrt(var2 + eps)).reshape(1, inner)

    return dict(w1=w1, w2=w2, s1=s1, b1=b1, s2=s2, b2=b2)


def _dense_layer_kernel(x_ref, b1_ref, w1_ref, b2_ref, w2c_ref, out_ref,
                        hpad_ref, *, TH, W, Gp, ew_dtype):
    j = pl.program_id(1)
    Mt = TH * W
    Ip = hpad_ref.shape[1]

    # BN1 (folded, pre-ReLU bias) + ReLU.  x streams in as bf16; elementwise
    # math is bf16 on v6e/v7x (bf16 VALU) and f32 on v5e.
    x = x_ref[0, 0].astype(ew_dtype)                       # ((TH+2)*W, Cp)
    t = jnp.maximum(x + b1_ref[...], 0.0)

    # 1x1 conv (+ folded BN2 scale) on the MXU, bf16 operands / f32 acc.
    h = jnp.dot(t.astype(jnp.bfloat16), w1_ref[...],
                preferred_element_type=jnp.float32)        # ((TH+2)*W, Ip)
    h = jnp.maximum(h + b2_ref[...], 0.0)
    hpad_ref[...] = h.astype(hpad_ref.dtype)

    # The 3x3 conv zero-pads h (not x) at the image border: overwrite the halo
    # rows that fall outside the image with zeros.
    @pl.when(j == 0)
    def _():
        hpad_ref[pl.ds(0, W), :] = jnp.zeros((W, Ip), hpad_ref.dtype)

    @pl.when(j == pl.num_programs(1) - 1)
    def _():
        hpad_ref[pl.ds((TH + 1) * W, W), :] = jnp.zeros((W, Ip), hpad_ref.dtype)

    # Column-boundary masks from an (Mt, 1) iota; jnp.where broadcasts them.
    col = jax.lax.broadcasted_iota(jnp.int32, (Mt, 1), 0) % W
    mask_l = col > 0            # left  tap (dx=0) invalid at x == 0
    mask_r = col < (W - 1)      # right tap (dx=2) invalid at x == W-1

    # 3x3 conv: per dy one wide matmul on the contiguous row slab; the three
    # dx taps come out of the same result via sublane rolls (XLU) + masks.
    # Accumulate in registers (no VMEM accumulator scratch).
    res = None
    for dy in range(3):
        slab = hpad_ref[pl.ds(dy * W, Mt), :]              # bf16, contiguous
        p = jnp.dot(slab, w2c_ref[dy],
                    preferred_element_type=jnp.float32)    # (Mt, 3*Gp) f32
        center = p[:, Gp:2 * Gp]                           # dx = 1
        left = jnp.where(mask_l,
                         pltpu.roll(p[:, 0:Gp], shift=1, axis=0), 0.0)
        right = jnp.where(mask_r,
                          pltpu.roll(p[:, 2 * Gp:3 * Gp], shift=Mt - 1, axis=0),
                          0.0)
        contrib = center + left + right
        res = contrib if res is None else res + contrib

    out_ref[0, 0] = res.astype(out_ref.dtype)


def dense_layer_forward_nhwc(x_nhwc, params, *, growth_rate):
    N, H, W, Cin = x_nhwc.shape
    inner = 4 * growth_rate
    if W % 8 != 0:
        raise NotImplementedError("W must be a multiple of 8 (sublane tiling)")

    TH = _pick_row_tile(H)            # output rows per grid step
    RT = H // TH
    Mt = TH * W

    Cp = _round_up(Cin, 128)
    Ip = _round_up(inner, 128)
    Gp = _round_up(growth_rate, 128)

    ew_dtype = _elementwise_dtype()

    w1, w2 = params["w1"], params["w2"]
    s1, b1, s2, b2 = params["s1"], params["b1"], params["s2"], params["b2"]

    # Fold eval-mode BN into the 1x1 conv (valid: s1 = gamma/sqrt(var+eps) > 0).
    w1f = (s1.reshape(Cin, 1) * w1) * s2.reshape(1, inner)    # diag(s1) W1 diag(s2)
    b1f = b1 / s1                                             # pre-ReLU bias

    # x: channel-pad to 128 lanes, pad one zero row top/bottom, cast to bf16,
    # and cut overlapping (TH+2)-row tiles (1-row halo) so every grid block is
    # a plain non-overlapping BlockSpec slab (static slices, no gather).
    x_pad = jnp.zeros((N, H + 2, W, Cp), jnp.bfloat16)
    x_pad = x_pad.at[:, 1:H + 1, :, :Cin].set(x_nhwc.astype(jnp.bfloat16))
    x_tiles = jnp.stack([x_pad[:, j * TH:j * TH + TH + 2] for j in range(RT)],
                        axis=1)                               # (N, RT, TH+2, W, Cp)
    x_tiles = x_tiles.reshape(N, RT, (TH + 2) * W, Cp)

    w1p = jnp.zeros((Cp, Ip), jnp.float32).at[:Cin, :inner].set(w1f)
    w1p = w1p.astype(jnp.bfloat16)
    b1p = jnp.zeros((1, Cp), jnp.float32).at[:, :Cin].set(b1f).astype(ew_dtype)
    b2p = jnp.zeros((1, Ip), jnp.float32).at[:, :inner].set(b2)

    # dx-concatenated 3x3 weights: w2c[dy, :, dx*Gp : dx*Gp+growth] = w2[dy, dx]
    # TODO(synk): on v6e/v7x a dy-fused (K=3*Ip) im2row variant would fill the
    #             256-deep MXU better; only worth it if the 3x3 matmuls bind.
    w2c = jnp.zeros((3, Ip, 3 * Gp), jnp.float32)
    for dx in range(3):
        w2c = w2c.at[:, :inner, dx * Gp:dx * Gp + growth_rate].set(w2[:, dx])
    w2c = w2c.astype(jnp.bfloat16)

    kernel = functools.partial(_dense_layer_kernel, TH=TH, W=W, Gp=Gp,
                               ew_dtype=ew_dtype)

    grid_spec = pltpu.PrefetchScalarGridSpec(
        num_scalar_prefetch=0,
        grid=(N, RT),
        in_specs=[
            # NOTE: if the x DMA is still exposed after row-tiling, this spec
            # can be given pipeline_mode=pl.Buffered(3).
            pl.BlockSpec((1, 1, (TH + 2) * W, Cp), lambda n, j: (n, j, 0, 0)),
            pl.BlockSpec((1, Cp), lambda n, j: (0, 0)),
            pl.BlockSpec((Cp, Ip), lambda n, j: (0, 0)),
            pl.BlockSpec((1, Ip), lambda n, j: (0, 0)),
            pl.BlockSpec((3, Ip, 3 * Gp), lambda n, j: (0, 0, 0)),
        ],
        out_specs=pl.BlockSpec((1, 1, Mt, Gp), lambda n, j: (n, j, 0, 0)),
        scratch_shapes=[
            pltpu.VMEM(((TH + 2) * W, Ip), jnp.bfloat16),   # halo-padded h
        ],
    )

    res_flat = pl.pallas_call(
        kernel,
        out_shape=jax.ShapeDtypeStruct((N, RT, Mt, Gp), jnp.bfloat16),
        grid_spec=grid_spec,
        compiler_params=pltpu.CompilerParams(
            dimension_semantics=("parallel", "parallel"),
            vmem_limit_bytes=_vmem_limit_bytes()),
    )(x_tiles, b1p, w1p, b2p, w2c)

    residual = res_flat[..., :growth_rate].reshape(N, H, W, growth_rate)
    # Shortcut concat stays outside the kernel (no redundant kernel I/O).
    return jnp.concatenate([x_nhwc, residual.astype(x_nhwc.dtype)], axis=-1)


def dense_layer_forward(x_nchw, params, *, growth_rate):
    """PyTorch-layout (NCHW) wrapper; stacked layers should use the NHWC path."""
    x_nhwc = jnp.transpose(x_nchw, (0, 2, 3, 1))
    y = dense_layer_forward_nhwc(x_nhwc, params, growth_rate=growth_rate)
    return jnp.transpose(y, (0, 3, 1, 2))


def reference(x_nchw, params, *, growth_rate):
    """Plain-JAX reference (same eval-mode BN semantics, unfolded, f32)."""
    inner = 4 * growth_rate
    Cin = x_nchw.shape[1]
    x = jnp.transpose(x_nchw, (0, 2, 3, 1))                   # NHWC
    t = jnp.maximum(x * params["s1"][0] + params["b1"][0], 0.0)
    h = jax.lax.conv_general_dilated(
        t, params["w1"].reshape(1, 1, Cin, inner),
        window_strides=(1, 1), padding="VALID",
        dimension_numbers=("NHWC", "HWIO", "NHWC"),
        precision=jax.lax.Precision.HIGHEST)
    h = jnp.maximum(h * params["s2"][0] + params["b2"][0], 0.0)
    r = jax.lax.conv_general_dilated(
        h, params["w2"],
        window_strides=(1, 1), padding="SAME",
        dimension_numbers=("NHWC", "HWIO", "NHWC"),
        precision=jax.lax.Precision.HIGHEST)
    out = jnp.concatenate([x, r], axis=-1)
    return jnp.transpose(out, (0, 3, 1, 2))                   # NCHW


if __name__ == "__main__":
    N, Cin, H, W = 2, 4, 16, 16
    growth = 8

    key = jax.random.PRNGKey(0)
    kx, kp = jax.random.split(key)
    x = jax.random.normal(kx, (N, Cin, H, W), jnp.float32)
    params = init_params(kp, Cin, growth)

    out = dense_layer_forward(x, params, growth_rate=growth)
    out = jax.block_until_ready(out)

    assert out.shape == (N, Cin + growth, H, W), out.shape
    ref = reference(x, params, growth_rate=growth)
    err = float(jnp.max(jnp.abs(out - ref)))
    # bf16 x stream + bf16 MXU operands + bf16 residual vs f32 HIGHEST reference.
    assert err < 5e-2, f"max abs err {err}"

    print("KERNEL_OK")
</pallas_src>

<mosaic_0001>
module attributes {stable_mosaic.version = 11 : i64} {
  func.func @_dense_layer_kernel(%arg0: i32, %arg1: i32, %arg2: memref<1x1x160x128xbf16, #tpu.memory_space<vmem>>, %arg3: memref<1x128xf32, #tpu.memory_space<vmem>>, %arg4: memref<128x128xbf16, #tpu.memory_space<vmem>>, %arg5: memref<1x128xf32, #tpu.memory_space<vmem>>, %arg6: memref<3x128x384xbf16, #tpu.memory_space<vmem>>, %arg7: memref<1x1x128x128xbf16, #tpu.memory_space<vmem>>, %arg8: memref<160x128xbf16, #tpu.memory_space<vmem>>) attributes {dimension_semantics = [#tpu.dimension_semantics<parallel>, #tpu.dimension_semantics<parallel>], iteration_bounds = array<i64: 2, 2>, scalar_prefetch = 0 : i64, scratch_operands = 1 : i64, tpu.core_type = #tpu.core_type<tc>, window_params = [{transform_indices = @transform_0, window_bounds = array<i64: 1, 1, 160, 128>}, {pipeline_mode = #tpu.pipeline_mode<synchronous>, transform_indices = @transform_1, window_bounds = array<i64: 1, 128>}, {pipeline_mode = #tpu.pipeline_mode<synchronous>, transform_indices = @transform_2, window_bounds = array<i64: 128, 128>}, {pipeline_mode = #tpu.pipeline_mode<synchronous>, transform_indices = @transform_3, window_bounds = array<i64: 1, 128>}, {pipeline_mode = #tpu.pipeline_mode<synchronous>, transform_indices = @transform_4, window_bounds = array<i64: 3, 128, 384>}, {transform_indices = @transform_5, window_bounds = array<i64: 1, 1, 128, 128>}]} {
    %c0 = arith.constant 0 : index
    %c0_0 = arith.constant 0 : index
    %c0_1 = arith.constant 0 : index
    %c0_2 = arith.constant 0 : index
    %0 = vector.load %arg2[%c0, %c0_0, %c0_1, %c0_2] : memref<1x1x160x128xbf16, #tpu.memory_space<vmem>>, vector<1x1x160x128xbf16>
    %1 = vector.shape_cast %0 : vector<1x1x160x128xbf16> to vector<160x128xbf16>
    %2 = arith.extf %1 : vector<160x128xbf16> to vector<160x128xf32>
    %c0_3 = arith.constant 0 : index
    %c0_4 = arith.constant 0 : index
    %3 = vector.load %arg3[%c0_3, %c0_4] : memref<1x128xf32, #tpu.memory_space<vmem>>, vector<1x128xf32>
    %4 = vector.broadcast %3 : vector<1x128xf32> to vector<160x128xf32>
    %5 = arith.addf %2, %4 : vector<160x128xf32>
    %cst = arith.constant 0.000000e+00 : f32
    %6 = vector.broadcast %cst : f32 to vector<160x128xf32>
    %7 = arith.maximumf %5, %6 : vector<160x128xf32>
    %8 = arith.truncf %7 : vector<160x128xf32> to vector<160x128xbf16>
    %c0_5 = arith.constant 0 : index
    %c0_6 = arith.constant 0 : index
    %9 = vector.load %arg4[%c0_5, %c0_6] : memref<128x128xbf16, #tpu.memory_space<vmem>>, vector<128x128xbf16>
    %cst_7 = arith.constant dense<0.000000e+00> : vector<160x128xf32>
    %10 = tpu.matmul %8, %9, %cst_7 {dimension_numbers = #tpu.dot_dimension_numbers<[1], [0], [0], [1], [0, 0, 1, 1], [], []>} : vector<160x128xbf16>, vector<128x128xbf16>, vector<160x128xf32> -> vector<160x128xf32>
    %c0_8 = arith.constant 0 : index
    %c0_9 = arith.constant 0 : index
    %11 = vector.load %arg5[%c0_8, %c0_9] : memref<1x128xf32, #tpu.memory_space<vmem>>, vector<1x128xf32>
    %12 = vector.broadcast %11 : vector<1x128xf32> to vector<160x128xf32>
    %13 = arith.addf %10, %12 : vector<160x128xf32>
    %cst_10 = arith.constant 0.000000e+00 : f32
    %14 = vector.broadcast %cst_10 : f32 to vector<160x128xf32>
    %15 = arith.maximumf %13, %14 : vector<160x128xf32>
    %16 = arith.truncf %15 : vector<160x128xf32> to vector<160x128xbf16>
    %c0_11 = arith.constant 0 : index
    %c0_12 = arith.constant 0 : index
    %17 = vector.load %arg8[%c0_11, %c0_12] : memref<160x128xbf16, #tpu.memory_space<vmem>>, vector<160x128xbf16>
    tpu.vector_store %arg8[%c0_11, %c0_12], %16 {strides = array<i32>} : memref<160x128xbf16, #tpu.memory_space<vmem>>, vector<160x128xbf16>,
    %c0_i32 = arith.constant 0 : i32
    %18 = arith.cmpi eq, %arg1, %c0_i32 : i32
    %19 = arith.extui %18 : i1 to i32
    %c0_i32_13 = arith.constant 0 : i32
    %20 = arith.cmpi ne, %19, %c0_i32_13 : i32
    scf.if %20 {
      %cst_50 = arith.constant 0.000000e+00 : bf16
      %108 = vector.broadcast %cst_50 : bf16 to vector<16x128xbf16>
      %c0_51 = arith.constant 0 : index
      %c0_52 = arith.constant 0 : index
      %109 = vector.load %arg8[%c0_51, %c0_52] : memref<160x128xbf16, #tpu.memory_space<vmem>>, vector<16x128xbf16>
      tpu.vector_store %arg8[%c0_51, %c0_52], %108 {strides = array<i32>} : memref<160x128xbf16, #tpu.memory_space<vmem>>, vector<16x128xbf16>,
    } else {
    }
    %c1_i32 = arith.constant 1 : i32
    %21 = arith.cmpi eq, %arg1, %c1_i32 : i32
    %22 = arith.extui %21 : i1 to i32
    %c0_i32_14 = arith.constant 0 : i32
    %23 = arith.cmpi ne, %22, %c0_i32_14 : i32
    scf.if %23 {
      %cst_50 = arith.constant 0.000000e+00 : bf16
      %108 = vector.broadcast %cst_50 : bf16 to vector<16x128xbf16>
      %c144 = arith.constant 144 : index
      %c0_51 = arith.constant 0 : index
      %109 = vector.load %arg8[%c144, %c0_51] : memref<160x128xbf16, #tpu.memory_space<vmem>>, vector<16x128xbf16>
      tpu.vector_store %arg8[%c144, %c0_51], %108 {strides = array<i32>} : memref<160x128xbf16, #tpu.memory_space<vmem>>, vector<16x128xbf16>,
    } else {
    }
    %24 = tpu.iota {dimensions = array<i32: 0>} : vector<128x1xi32>
    %c16_i32 = arith.constant 16 : i32
    %c0_i32_15 = arith.constant 0 : i32
    %25 = arith.cmpi eq, %c16_i32, %c0_i32_15 : i32
    %c1_i32_16 = arith.constant 1 : i32
    %26 = arith.select %25, %c1_i32_16, %c16_i32 : i32
    %27 = vector.broadcast %26 : i32 to vector<128x1xi32>
    %28 = arith.remsi %24, %27 : vector<128x1xi32>
    %c0_i32_17 = arith.constant 0 : i32
    %29 = vector.broadcast %c0_i32_17 : i32 to vector<128x1xi32>
    %30 = arith.cmpi ne, %28, %29 : vector<128x1xi32>
    %c0_i32_18 = arith.constant 0 : i32
    %31 = vector.broadcast %c0_i32_18 : i32 to vector<128x1xi32>
    %32 = arith.cmpi slt, %28, %31 : vector<128x1xi32>
    %c0_i32_19 = arith.constant 0 : i32
    %33 = arith.cmpi slt, %26, %c0_i32_19 : i32
    %34 = vector.broadcast %33 : i1 to vector<128x1xi1>
    %35 = vector.broadcast %34 : vector<128x1xi1> to vector<128x1xi1>
    %36 = arith.xori %32, %35 : vector<128x1xi1>
    %37 = arith.andi %36, %30 : vector<128x1xi1>
    %38 = vector.broadcast %26 : i32 to vector<128x1xi32>
    %39 = arith.addi %28, %38 : vector<128x1xi32>
    %40 = arith.select %37, %39, %28 : vector<128x1xi1>, vector<128x1xi32>
    %c0_i32_20 = arith.constant 0 : i32
    %41 = vector.broadcast %c0_i32_20 : i32 to vector<128x1xi32>
    %42 = arith.cmpi sgt, %40, %41 : vector<128x1xi32>
    %c15_i32 = arith.constant 15 : i32
    %43 = vector.broadcast %c15_i32 : i32 to vector<128x1xi32>
    %44 = arith.cmpi slt, %40, %43 : vector<128x1xi32>
    %c0_21 = arith.constant 0 : index
    %c0_22 = arith.constant 0 : index
    %45 = vector.load %arg8[%c0_21, %c0_22] : memref<160x128xbf16, #tpu.memory_space<vmem>>, vector<128x128xbf16>
    %c0_23 = arith.constant 0 : index
    %c0_24 = arith.constant 0 : index
    %c0_25 = arith.constant 0 : index
    %46 = vector.load %arg6[%c0_23, %c0_24, %c0_25] : memref<3x128x384xbf16, #tpu.memory_space<vmem>>, vector<1x128x384xbf16>
    %47 = vector.shape_cast %46 : vector<1x128x384xbf16> to vector<128x384xbf16>
    %cst_26 = arith.constant dense<0.000000e+00> : vector<128x384xf32>
    %48 = tpu.matmul %45, %47, %cst_26 {dimension_numbers = #tpu.dot_dimension_numbers<[1], [0], [0], [1], [0, 0, 1, 1], [], []>} : vector<128x128xbf16>, vector<128x384xbf16>, vector<128x384xf32> -> vector<128x384xf32>
    %49 = vector.extract_strided_slice %48 {offsets = [0, 128], sizes = [128, 128], strides = [1, 1]} : vector<128x384xf32> to vector<128x128xf32>
    %50 = vector.extract_strided_slice %48 {offsets = [0, 0], sizes = [128, 128], strides = [1, 1]} : vector<128x384xf32> to vector<128x128xf32>
    %c1_i32_27 = arith.constant 1 : i32
    %51 = tpu.dynamic_rotate %50 by %c1_i32_27 dim 0 : vector<128x128xf32>, i32 -> vector<128x128xf32>
    %cst_28 = arith.constant 0.000000e+00 : f32
    %52 = vector.shape_cast %42 : vector<128x1xi1> to vector<128x1xi1>
    %53 = vector.broadcast %52 : vector<128x1xi1> to vector<128x128xi1>
    %54 = vector.broadcast %cst_28 : f32 to vector<128x128xf32>
    %55 = arith.select %53, %51, %54 : vector<128x128xi1>, vector<128x128xf32>
    %56 = vector.extract_strided_slice %48 {offsets = [0, 256], sizes = [128, 128], strides = [1, 1]} : vector<128x384xf32> to vector<128x128xf32>
    %c127_i32 = arith.constant 127 : i32
    %57 = tpu.dynamic_rotate %56 by %c127_i32 dim 0 : vector<128x128xf32>, i32 -> vector<128x128xf32>
    %cst_29 = arith.constant 0.000000e+00 : f32
    %58 = vector.shape_cast %44 : vector<128x1xi1> to vector<128x1xi1>
    %59 = vector.broadcast %58 : vector<128x1xi1> to vector<128x128xi1>
    %60 = vector.broadcast %cst_29 : f32 to vector<128x128xf32>
    %61 = arith.select %59, %57, %60 : vector<128x128xi1>, vector<128x128xf32>
    %62 = arith.addf %49, %55 : vector<128x128xf32>
    %63 = arith.addf %62, %61 : vector<128x128xf32>
    %c16 = arith.constant 16 : index
    %c0_30 = arith.constant 0 : index
    %64 = vector.load %arg8[%c16, %c0_30] : memref<160x128xbf16, #tpu.memory_space<vmem>>, vector<128x128xbf16>
    %c1 = arith.constant 1 : index
    %c0_31 = arith.constant 0 : index
    %c0_32 = arith.constant 0 : index
    %65 = vector.load %arg6[%c1, %c0_31, %c0_32] : memref<3x128x384xbf16, #tpu.memory_space<vmem>>, vector<1x128x384xbf16>
    %66 = vector.shape_cast %65 : vector<1x128x384xbf16> to vector<128x384xbf16>
    %cst_33 = arith.constant dense<0.000000e+00> : vector<128x384xf32>
    %67 = tpu.matmul %64, %66, %cst_33 {dimension_numbers = #tpu.dot_dimension_numbers<[1], [0], [0], [1], [0, 0, 1, 1], [], []>} : vector<128x128xbf16>, vector<128x384xbf16>, vector<128x384xf32> -> vector<128x384xf32>
    %68 = vector.extract_strided_slice %67 {offsets = [0, 128], sizes = [128, 128], strides = [1, 1]} : vector<128x384xf32> to vector<128x128xf32>
    %69 = vector.extract_strided_slice %67 {offsets = [0, 0], sizes = [128, 128], strides = [1, 1]} : vector<128x384xf32> to vector<128x128xf32>
    %c1_i32_34 = arith.constant 1 : i32
    %70 = tpu.dynamic_rotate %69 by %c1_i32_34 dim 0 : vector<128x128xf32>, i32 -> vector<128x128xf32>
    %cst_35 = arith.constant 0.000000e+00 : f32
    %71 = vector.shape_cast %42 : vector<128x1xi1> to vector<128x1xi1>
    %72 = vector.broadcast %71 : vector<128x1xi1> to vector<128x128xi1>
    %73 = vector.broadcast %cst_35 : f32 to vector<128x128xf32>
    %74 = arith.select %72, %70, %73 : vector<128x128xi1>, vector<128x128xf32>
    %75 = vector.extract_strided_slice %67 {offsets = [0, 256], sizes = [128, 128], strides = [1, 1]} : vector<128x384xf32> to vector<128x128xf32>
    %c127_i32_36 = arith.constant 127 : i32
    %76 = tpu.dynamic_rotate %75 by %c127_i32_36 dim 0 : vector<128x128xf32>, i32 -> vector<128x128xf32>
    %cst_37 = arith.constant 0.000000e+00 : f32
    %77 = vector.shape_cast %44 : vector<128x1xi1> to vector<128x1xi1>
    %78 = vector.broadcast %77 : vector<128x1xi1> to vector<128x128xi1>
    %79 = vector.broadcast %cst_37 : f32 to vector<128x128xf32>
    %80 = arith.select %78, %76, %79 : vector<128x128xi1>, vector<128x128xf32>
    %81 = arith.addf %68, %74 : vector<128x128xf32>
    %82 = arith.addf %81, %80 : vector<128x128xf32>
    %83 = arith.addf %63, %82 : vector<128x128xf32>
    %c32 = arith.constant 32 : index
    %c0_38 = arith.constant 0 : index
    %84 = vector.load %arg8[%c32, %c0_38] : memref<160x128xbf16, #tpu.memory_space<vmem>>, vector<128x128xbf16>
    %c2 = arith.constant 2 : index
    %c0_39 = arith.constant 0 : index
    %c0_40 = arith.constant 0 : index
    %85 = vector.load %arg6[%c2, %c0_39, %c0_40] : memref<3x128x384xbf16, #tpu.memory_space<vmem>>, vector<1x128x384xbf16>
    %86 = vector.shape_cast %85 : vector<1x128x384xbf16> to vector<128x384xbf16>
    %cst_41 = arith.constant dense<0.000000e+00> : vector<128x384xf32>
    %87 = tpu.matmul %84, %86, %cst_41 {dimension_numbers = #tpu.dot_dimension_numbers<[1], [0], [0], [1], [0, 0, 1, 1], [], []>} : vector<128x128xbf16>, vector<128x384xbf16>, vector<128x384xf32> -> vector<128x384xf32>
    %88 = vector.extract_strided_slice %87 {offsets = [0, 128], sizes = [128, 128], strides = [1, 1]} : vector<128x384xf32> to vector<128x128xf32>
    %89 = vector.extract_strided_slice %87 {offsets = [0, 0], sizes = [128, 128], strides = [1, 1]} : vector<128x384xf32> to vector<128x128xf32>
    %c1_i32_42 = arith.constant 1 : i32
    %90 = tpu.dynamic_rotate %89 by %c1_i32_42 dim 0 : vector<128x128xf32>, i32 -> vector<128x128xf32>
    %cst_43 = arith.constant 0.000000e+00 : f32
    %91 = vector.shape_cast %42 : vector<128x1xi1> to vector<128x1xi1>
    %92 = vector.broadcast %91 : vector<128x1xi1> to vector<128x128xi1>
    %93 = vector.broadcast %cst_43 : f32 to vector<128x128xf32>
    %94 = arith.select %92, %90, %93 : vector<128x128xi1>, vector<128x128xf32>
    %95 = vector.extract_strided_slice %87 {offsets = [0, 256], sizes = [128, 128], strides = [1, 1]} : vector<128x384xf32> to vector<128x128xf32>
    %c127_i32_44 = arith.constant 127 : i32
    %96 = tpu.dynamic_rotate %95 by %c127_i32_44 dim 0 : vector<128x128xf32>, i32 -> vector<128x128xf32>
    %cst_45 = arith.constant 0.000000e+00 : f32
    %97 = vector.shape_cast %44 : vector<128x1xi1> to vector<128x1xi1>
    %98 = vector.broadcast %97 : vector<128x1xi1> to vector<128x128xi1>
    %99 = vector.broadcast %cst_45 : f32 to vector<128x128xf32>
    %100 = arith.select %98, %96, %99 : vector<128x128xi1>, vector<128x128xf32>
    %101 = arith.addf %88, %94 : vector<128x128xf32>
    %102 = arith.addf %101, %100 : vector<128x128xf32>
    %103 = arith.addf %83, %102 : vector<128x128xf32>
    %104 = arith.truncf %103 : vector<128x128xf32> to vector<128x128xbf16>
    %c0_46 = arith.constant 0 : index
    %c0_47 = arith.constant 0 : index
    %c0_48 = arith.constant 0 : index
    %c0_49 = arith.constant 0 : index
    %105 = vector.load %arg7[%c0_46, %c0_47, %c0_48, %c0_49] : memref<1x1x128x128xbf16, #tpu.memory_space<vmem>>, vector<1x1x128x128xbf16>
    %106 = vector.shape_cast %105 : vector<1x1x128x128xbf16> to vector<128x128xbf16>
    %107 = vector.shape_cast %104 : vector<128x128xbf16> to vector<1x1x128x128xbf16>
    tpu.vector_store %arg7[%c0_46, %c0_47, %c0_48, %c0_49], %107 {strides = array<i32>} : memref<1x1x128x128xbf16, #tpu.memory_space<vmem>>, vector<1x1x128x128xbf16>,
    return
  }
  func.func @transform_0(%arg0: i32, %arg1: i32) -> (i32, i32, i32, i32) {
    %c0_i32 = arith.constant 0 : i32
    %c0_i32_0 = arith.constant 0 : i32
    %c0_i32_1 = arith.constant 0 : i32
    return %arg0, %arg1, %c0_i32, %c0_i32_0 : i32, i32, i32, i32
  }
  func.func @transform_1(%arg0: i32, %arg1: i32) -> (i32, i32) {
    %c0_i32 = arith.constant 0 : i32
    %c0_i32_0 = arith.constant 0 : i32
    %c0_i32_1 = arith.constant 0 : i32
    return %c0_i32, %c0_i32_0 : i32, i32
  }
  func.func @transform_2(%arg0: i32, %arg1: i32) -> (i32, i32) {
    %c0_i32 = arith.constant 0 : i32
    %c0_i32_0 = arith.constant 0 : i32
    %c0_i32_1 = arith.constant 0 : i32
    return %c0_i32, %c0_i32_0 : i32, i32
  }
  func.func @transform_3(%arg0: i32, %arg1: i32) -> (i32, i32) {
    %c0_i32 = arith.constant 0 : i32
    %c0_i32_0 = arith.constant 0 : i32
    %c0_i32_1 = arith.constant 0 : i32
    return %c0_i32, %c0_i32_0 : i32, i32
  }
  func.func @transform_4(%arg0: i32, %arg1: i32) -> (i32, i32, i32) {
    %c0_i32 = arith.constant 0 : i32
    %c0_i32_0 = arith.constant 0 : i32
    %c0_i32_1 = arith.constant 0 : i32
    %c0_i32_2 = arith.constant 0 : i32
    return %c0_i32, %c0_i32_0, %c0_i32_1 : i32, i32, i32
  }
  func.func @transform_5(%arg0: i32, %arg1: i32) -> (i32, i32, i32, i32) {
    %c0_i32 = arith.constant 0 : i32
    %c0_i32_0 = arith.constant 0 : i32
    %c0_i32_1 = arith.constant 0 : i32
    return %arg0, %arg1, %c0_i32, %c0_i32_0 : i32, i32, i32, i32
  }
}

</mosaic_0001>

<bundles_post_ra>
// kernel: tpu_custom_call.1
= control target key start
LH: loop header
LB: loop body
LE: loop exit
PB: predicated region body
PF: predicated region fallthrough
CT: control target
= control target key end

     0   :  { %s4643_s0 = inlined_call_operand.hbm [shape: bf16[2,2,160,128], index: 0, kind: input, shape index: {}]   ;;  %s4644_s1 = inlined_call_operand.vmem [shape: f32[1,128], index: 1, kind: input, shape index: {}]   ;;  %s4645_s2 = inlined_call_operand.hbm [shape: bf16[128,128], index: 2, kind: input, shape index: {}]   ;;  %s4646_s3 = inlined_call_operand.vmem [shape: f32[1,128], index: 3, kind: input, shape index: {}]   ;;  %s4647_s4 = inlined_call_operand.hbm [shape: bf16[3,128,384], index: 4, kind: input, shape index: {}]   ;;  %s4648_s5 = inlined_call_operand.hbm [shape: bf16[2,2,128,128], index: 5, kind: output, shape index: {}]  }
   0x1   :  { %4676 = sst [smem:[#allocation27_spill]] %s4645_s2 }
   0x2   :  { %4677 = sst [smem:[#allocation28_spill]] %s4647_s4 }
   0x3   :  { %10 = vsyncpa [#allocation4], 0 }
   0x4   :  { %12 = vsyncpa [#allocation4 + $0x1], 0 }
   0x5   :  { %13 = vsyncpa [#allocation7], 0 }
   0x6   :  { %14 = vsyncpa [#allocation5], 0 }
   0x7   :  { %16 = vsyncpa [#allocation5 + $0x1], 0  ;;  %s3562_s18 = smov 0   ;;  %s3564_s19 = smov 0  }
   0x8   :  { %s3566_s20 = smov 0   ;;  %s3568_s21 = smov 0  }
   0x9   :  { %s3570_s22 = smov 0   ;;  %s3572_s23 = smov 0  }
   0xa   :  { %s3574_s24 = smov 0   ;;  %s3576_s25 = smov 0  }
   0xb LB: > { %4678 = sst [smem:[#allocation13_spill]] %s3489_s18  ;;  %s2686_s26 = sadd.s32 4294967295, %s3517_s25   ;;  %s3517_s25 = sphi %s3576_s25, %s22_s25   ;;  %s3513_s24 = sphi %s3574_s24, %s4813_s24   ;;  %s3509_s23 = sphi %s3572_s23, %s4807_s23   ;;  %s3505_s22 = sphi %s3570_s22, %s4812_s22   ;;  %s3501_s21 = sphi %s3568_s21, %s4806_s21   ;;  %s3497_s20 = sphi %s3566_s20, %s4811_s20   ;;  %s3493_s19 = sphi %s3564_s19, %s4810_s19   ;;  %s3489_s18 = sphi %s3562_s18, %s4809_s18  }
   0xc   : > { %4679 = sst [smem:[#allocation14_spill]] %s3509_s23  ;;  %s2687_s27 = sadd.s32 4294967294, %s3517_s25  }
   0xd   : > { %p56_p0 = scmp.ne.s32.totalorder %s3493_s19, %s3489_s18  ;;  %p3606_p1 = scmp.eq.s32.totalorder %s2686_s26, 0 }
   0xe   : > { %p3610_p2 = scmp.eq.s32.totalorder %s2686_s26, 3  ;;  %p172_p3 = scmp.eq.s32.totalorder %s2687_s27, 3 }
   0xf   : > { %s4680_s28 = scalar_select %p3606_p1, 1, 0 }
  0x10   : > { %s4681_s29 = scalar_select %p3610_p2, 1, 0 }
  0x11   : > { %p3616_p4 = por %p3606_p1, %p56_p0  ;;  %p2688_p5 = scmp.ge.s32.totalorder %s3517_s25, 1 }
  0x12   : > { %p3621_p6 = por %p172_p3, %p56_p0  ;;  %p179_p7 = scmp.lt.s32.totalorder %s3517_s25, 5 }
  0x13   : > { %s4682_s30 = scalar_select %p3616_p4, 1, 0 }
  0x14   : > { %s4683_s6 = scalar_select %p3621_p6, 1, 0 }
  0x15   : > { %p3626_p8 = pnand %p2688_p5, %p179_p7  ;;  %s3519_s8 = smov [#allocation6]  }
  0x16   : > { %4684 = sst [smem:[#allocation15_spill]] %s4683_s6  ;;  %s194_s9 = sshll.u32 %s3519_s8, 4  ;;  %s195_s9 = int_to_ptr.vmem [resolvable:$true] %s194_s9 }
  0x17   : > { %s4685_s7 = scalar_select %p3626_p8, 1, 0 }
  0x18   : > { %p3129_p9 = pneg %p3626_p8  ;;  %s3520_s11 = smov [#allocation8]  }
  0x19   : > { %s210_s12 = sshll.u32 %s3520_s11, 4  ;;  %s4687_s2 = sld [smem:[#allocation27_spill]]  ;;  %s3638_s12 = int_to_ptr.vmem [resolvable:$true] %s210_s12 }
  0x1a   : > { %p3634_p10 = pnand %p3129_p9, %p3606_p1 }
  0x1c   : > { %p3331_p12 = pneg %p3634_p10 }
  0x1f   : > { %s3329_s15 = scalar_lea.hbm %s4687_s2, 1024 }
  0x20   : > { %p3330_p11 = scmp.ne.s32.totalorder %s4687_s2, %s3329_s15  ;;  %p3336_p3 = scmp.lt.u32.totalorder %s3329_s15, %s4687_s2 }
  0x22   : > { %p3332_p13 = pnand %p3331_p12, %p3330_p11 }
  0x24   : > { %p3333_p0 = pneg %p3332_p13 }
  0x26   : > { %p3338_p5 = pnand %p3336_p3, %p3333_p0 }
  0x28   : > { %3341 = shalt.err (!%p3338_p5)
}
  0x29   : > { %s3342_s8 = scalar_lea.vmem %s195_s9, 1024  ;;  %p3350_p1 = scmp.lt.s32.totalorder %s195_s9, %s195_s9 }
  0x2a   : > { %p3343_p7 = scmp.ne.s32.totalorder %s195_s9, %s3342_s8  ;;  %p3351_p4 = scmp.lt.s32.totalorder %s3342_s8, %s3342_s8 }
  0x2c   : > { %p3345_p9 = pnand %p3343_p7, %p3331_p12  ;;  %p3352_p8 = por %p3351_p4, %p3350_p1 }
  0x2e   : > { %p3346_p6 = pneg %p3345_p9 }
  0x30   : > { %p3353_p2 = pnand %p3352_p8, %p3346_p6 }
  0x32   : > { %3356 = shalt.err (!%p3353_p2)
}
  0x33   : > { %s4655_s11 = smov 64   ;;  %s4656_s13 = smov 4  }
  0x34   : > { %3132 = dma.hbm_to_vmem [thread:$0]  (!%p3634_p10), %s4687_s2, 1024, %s195_s9, [#allocation7], %s4655_s11, %s4655_s11, %s4656_s13  }
  0x35   : > { %s4688_s4 = sld [smem:[#allocation28_spill]] }
  0x3b   : > { %s3357_s26 = scalar_lea.hbm %s4688_s4, 9216 }
  0x3c   : > { %p3358_p1 = scmp.ne.s32.totalorder %s4688_s4, %s3357_s26  ;;  %p3364_p6 = scmp.lt.u32.totalorder %s3357_s26, %s4688_s4 }
  0x3e   : > { %p3360_p2 = pnand %p3358_p1, %p3331_p12 }
  0x40   : > { %p3361_p4 = pneg %p3360_p2 }
  0x42   : > { %p3366_p8 = pnand %p3364_p6, %p3361_p4 }
  0x44   : > { %3369 = shalt.err (!%p3366_p8)
}
  0x45   : > { %s3370_s9 = scalar_lea.vmem %s3638_s12, 9216  ;;  %p3378_p3 = scmp.lt.s32.totalorder %s3638_s12, %s3638_s12 }
  0x46   : > { %p3371_p11 = scmp.ne.s32.totalorder %s3638_s12, %s3370_s9  ;;  %p3379_p5 = scmp.lt.s32.totalorder %s3370_s9, %s3370_s9 }
  0x48   : > { %p3373_p13 = pnand %p3371_p11, %p3331_p12  ;;  %p3380_p7 = por %p3379_p5, %p3378_p3 }
  0x4a   : > { %p3374_p0 = pneg %p3373_p13 }
  0x4c   : > { %p3381_p9 = pnand %p3380_p7, %p3374_p0 }
  0x4e   : > { %3384 = shalt.err (!%p3381_p9)
}
  0x4f   : > { %s3523_s18 = smov 192   ;;  %s3524_s6 = smov 12  }
  0x50   : > { %3135 = dma.hbm_to_vmem [thread:$0]  (!%p3634_p10), %s4688_s4, 9216, %s3638_s12, [#allocation7], %s3523_s18, %s3523_s18, %s3524_s6  }
  0x51   : > { %s31_s16 = sadd.s32 1, %s3509_s23  ;;  %s34_s17 = sadd.s32 1, %s3513_s24 }
  0x52   : > { %p32_p12 = scmp.ge.s32.totalorder %s31_s16, 2  ;;  %s43_s26 = sadd.s32 1, %s3497_s20 }
  0x53   : > { %p50_p1 = scmp.ne.s32.totalorder %s3497_s20, %s3493_s19  ;;  %p51_p2 = scmp.eq.s32.totalorder %s3517_s25, 0 }
  0x54   : > { %s4815_s16 = smov (%p32_p12, %s31_s16), 0  ;;  %s4817_s17 = smov (!%p32_p12, %s34_s17), %s3513_s24 }
  0x55   : > { %4689 = sst [smem:[#allocation16_spill]] %s4815_s16  ;;  %s39_s27 = ssub.s32 %s3509_s23, %s4815_s16 }
  0x56   : > { %p3701_p4 = por %p51_p2, %p50_p1  ;;  %p36_p10 = scmp.ge.s32.totalorder %s4817_s17, 2 }
  0x57   : > { %p4691_p6 = scmp.ne.s32.totalorder %s4681_s29, 0  ;;  %p3146_p11 = scmp.lt.s32.totalorder %s3517_s25, 4 }
  0x58   : > { %s224_s8 = sand.u32 1, %s3497_s20   ;;  %s4819_s17 = smov (%p36_p10, %s4817_s17), 0 }
  0x59   : > { %p3707_p8 = por %p4691_p6, %p50_p1  ;;  %4693 = sst [smem:[#allocation17_spill]] %s4819_s17 }
  0x5a   : > { %s3113_s9 = smul.u32 80, %s224_s8  ;;  %s38_s18 = ssub.s32 %s3513_s24, %s4819_s17 }
  0x5b   : > { %s3114_s6 = smul.u32 20, %s3509_s23  ;;  %s40_s14 = sor.u32 %s39_s27, %s38_s18 }
  0x5c   : > { %p41_p13 = scmp.eq.s32.totalorder %s40_s14, 0  ;;  %s3115_s15 = smul.u32 40, %s3513_s24 }
  0x5d   : > { %s228_s11 = scalar_lea.vmem [#allocation3], %s3113_s9  ;;  %p3721_p0 = pnand %p3146_p11, %p3701_p4 }
  0x5e   : > { %s237_s13 = sshll.u32 %s228_s11, 4  ;;  %s234_s4 = sadd.s32 %s3115_s15, %s3114_s6  ;;  %s3728_s13 = int_to_ptr.vmem [resolvable:$true] %s237_s13 }
  0x5f   : > { %s3726_s2 = scalar_select %p41_p13, %s3497_s20, %s43_s26  }
  0x60   : > { %s2692_s16 = sshll.u32 %s234_s4, 6  ;;  %s3735_s11 = scalar_lea.sflag [#allocation4], %s224_s8 }
  0x61   : > { %s3733_s27 = scalar_lea.hbm %s4643_s0, %s2692_s16  ;;  %p3387_p5 = pneg %p3721_p0 }
  0x62   : > { %s3385_s10 = scalar_lea.hbm %s3733_s27, 1280  ;;  %s3390_s23 = scalar_lea.hbm %s4643_s0, 5120 }
  0x63   : > { %p3386_p3 = scmp.ne.s32.totalorder %s3733_s27, %s3385_s10  ;;  %p3391_p12 = scmp.lt.u32.totalorder %s3733_s27, %s4643_s0 }
  0x64   : > { %p3392_p1 = scmp.lt.u32.totalorder %s3390_s23, %s3385_s10  ;;  %p3394_p4 = scmp.lt.u32.totalorder %s3385_s10, %s3733_s27 }
  0x65   : > { %p3388_p7 = pnand %p3387_p5, %p3386_p3 }
  0x66   : > { %p3393_p2 = por %p3392_p1, %p3391_p12 }
  0x67   : > { %p3389_p9 = pneg %p3388_p7 }
  0x68   : > { %p3395_p10 = por %p3394_p4, %p3393_p2 }
  0x6a   : > { %p3396_p6 = pnand %p3395_p10, %p3389_p9 }
  0x6c   : > { %3399 = shalt.err (!%p3396_p6)
}
  0x6d   : > { %s3400_s8 = scalar_lea.vmem %s3728_s13, 1280  ;;  %s3525_s9 = smov [#allocation3]  }
  0x6e   : > { %p3401_p11 = scmp.ne.s32.totalorder %s3728_s13, %s3400_s8  ;;  %s3405_s18 = sshll.u32 %s3525_s9, 4  ;;  %s3406_s18 = int_to_ptr.vmem [resolvable:$false] %s3405_s18 }
  0x6f   : > { %s3407_s6 = scalar_lea.vmem %s3406_s18, 2560  ;;  %p3408_p7 = scmp.lt.s32.totalorder %s3728_s13, %s3406_s18 }
  0x70   : > { %p3403_p13 = pnand %p3401_p11, %p3387_p5  ;;  %p3409_p12 = scmp.lt.s32.totalorder %s3407_s6, %s3400_s8 }
  0x72   : > { %p3404_p3 = pneg %p3403_p13  ;;  %p3410_p1 = por %p3409_p12, %p3408_p7 }
  0x74   : > { %p3411_p2 = pnand %p3410_p1, %p3404_p3 }
  0x76   : > { %3414 = shalt.err (!%p3411_p2)
}
  0x77   : > { %s4695_s14 = smov 4   ;;  %s4696_s15 = smov 64  }
  0x78   : > { %3139 = dma.hbm_to_vmem [thread:$0]  (!%p3721_p0), %s3733_s27, 1280, %s3728_s13, %s3735_s11, %s4696_s15, %s4696_s15, %s4695_s14  }
  0x79   : > { %p4697_p5 = scmp.ne.s32.totalorder %s4685_s7, 0 }
  0x7b   : > { %249 = sbr.rel (%p4697_p5) target bundleno = 859 (0x35b), region = 40 }
  0x82   : > { %s3769_s10 = sand.u32 1, %s3493_s19   ;;  %p4698_p9 = scmp.ne.s32.totalorder %s4682_s30, 0 }
  0x83   : > { %s3116_s4 = smul.u32 80, %s3769_s10  ;;  %s252_s26 = scalar_lea.sflag [#allocation4], %s3769_s10 }
  0x85   : > { %s3773_s23 = scalar_lea.vmem [#allocation3], %s3116_s4 }
  0x86   : > { %3476 = dma.done.wait (%p4698_p9), %s252_s26, 1280  }
  0x87   : > { %3478 = vsyncadd (%p4698_p9), %s252_s26, 4294966016  ;;  %p4699_p0 = scmp.ne.s32.totalorder %s4680_s28, 0 }
  0x89   : > { %3480 = dma.done.wait (%p4699_p0), [#allocation7], 10240  }
  0x8a   : > { %3482 = vsyncadd (%p4699_p0), [#allocation7], 4294957056  ;;  %s2696_s7 = sshll.u32 %s3769_s10, 6  ;;  %v3225_v0 = vld [vmem:[#allocation6] sm:$0xff]   ;;  %v3226_v1 = vld [vmem:[#allocation6 + $0x8] sm:$0xff]   ;;  %p2707_p4 = scmp.ne.s32.totalorder %s3501_s21, 0 }
  0x8b   : > { %2981 = vmatprep.subr.bf16.mxu0 %v3225_v0  ;;  %v3227_v2 = vld [vmem:[#allocation6 + $0x10] sm:$0xff]   ;;  %v3228_v3 = vld [vmem:[#allocation6 + $0x18] sm:$0xff]   ;;  %v3229_v10 = vld [vmem:[#allocation6 + $0x20] sm:$0xff]   ;;  %s3846_s27 = scalar_lea.vmem [#allocation9], %s2696_s7 }
  0x8c   : > { %2982 = vmatpush3.bf16.msra.mxu0 %v3225_v0  ;;  %v2820_v4 = vld [vmem:[%s3773_s23] sm:$0xff]   ;;  %v2899_v14 = vld [vmem:[%s3773_s23 + $0x8] sm:$0xff]   ;;  %v2900_v16 = vld [vmem:[%s3773_s23 + $0x10] sm:$0xff]  }
  0x8d   : > { %2983 = vmatprep.subr.bf16.mxu0 %v3226_v1  ;;  %v3788_v5 = vld [vmem:[%s4644_s1] ss:$0 sm:$0xff]  ;;  %v2821_v6 = vunpack.c.l.bf16 %v2820_v4  ;;  %v2822_v7 = vunpack.c.h.bf16 %v2820_v4  ;;  %v3230_v15 = vld [vmem:[#allocation6 + $0x28] sm:$0xff]   ;;  %v2825_v17 = vunpack.c.l.bf16 %v2899_v14  ;;  %v2826_v18 = vunpack.c.h.bf16 %v2899_v14  ;;  %v3232_v27 = vld [vmem:[#allocation6 + $0x38] sm:$0xff]  }
  0x8e   : > { %v2829_v19 = vunpack.c.l.bf16 %v2900_v16  ;;  %v2830_v20 = vunpack.c.h.bf16 %v2900_v16  ;;  %v3231_v21 = vld [vmem:[#allocation6 + $0x30] sm:$0xff]   ;;  %v2901_v26 = vld [vmem:[%s3773_s23 + $0x18] sm:$0xff]   ;;  %v2903_v43 = vld [vmem:[%s3773_s23 + $0x28] sm:$0xff]  }
  0x8f   : > { %v338_v8 = vadd.f32 %v2821_v6, %v3788_v5  ;;  %v339_v9 = vadd.f32 %v2822_v7, %v3788_v5  ;;  %v340_v22 = vadd.f32 %v2825_v17, %v3788_v5  ;;  %v341_v23 = vadd.f32 %v2826_v18, %v3788_v5  ;;  %v2902_v28 = vld [vmem:[%s3773_s23 + $0x20] sm:$0xff]   ;;  %v2904_v44 = vld [vmem:[%s3773_s23 + $0x30] sm:$0xff]   ;;  %v2905_v59 = vld [vmem:[%s3773_s23 + $0x38] sm:$0xff]  }
  0x90   : > { %2984 = vmatpush3.bf16.msra.mxu0 %v3226_v1  ;;  %v342_v24 = vadd.f32 %v2829_v19, %v3788_v5  ;;  %v343_v25 = vadd.f32 %v2830_v20, %v3788_v5  ;;  %v2833_v31 = vunpack.c.l.bf16 %v2901_v26  ;;  %v2834_v32 = vunpack.c.h.bf16 %v2901_v26  ;;  %v2906_v60 = vld [vmem:[%s3773_s23 + $0x40] sm:$0xff]  }
  0x91   : > { %2985 = vmatprep.subr.bf16.mxu0 %v3227_v2  ;;  %v358_v11 = vmax.f32 %v338_v8, 0.0  ;;  %v359_v12 = vmax.f32 %v339_v9, 0.0  ;;  %v360_v29 = vmax.f32 %v340_v22, 0.0  ;;  %v361_v30 = vmax.f32 %v341_v23, 0.0  ;;  %v3822_v26 = vld [vmem:[%s4646_s3] ss:$0 sm:$0xff] }
  0x92   : > { %v362_v33 = vmax.f32 %v342_v24, 0.0  ;;  %v363_v34 = vmax.f32 %v343_v25, 0.0  ;;  %v2837_v35 = vunpack.c.l.bf16 %v2902_v28  ;;  %v2838_v36 = vunpack.c.h.bf16 %v2902_v28 }
  0x93   : > { %v378_v13 = vpack.c.bf16 %v359_v12, %v358_v11  ;;  %v379_v37 = vpack.c.bf16 %v361_v30, %v360_v29  ;;  %v344_v38 = vadd.f32 %v2833_v31, %v3788_v5  ;;  %v345_v39 = vadd.f32 %v2834_v32, %v3788_v5  ;;  %v2907_v12 = vld [vmem:[%s3773_s23 + $0x48] sm:$0xff]  }
  0x94   : > { %2986 = vmatpush3.bf16.msra.mxu0 %v3227_v2  ;;  %v380_v40 = vpack.c.bf16 %v363_v34, %v362_v33  ;;  %v346_v41 = vadd.f32 %v2837_v35, %v3788_v5  ;;  %v347_v42 = vadd.f32 %v2838_v36, %v3788_v5  ;;  %v2841_v47 = vunpack.c.l.bf16 %v2903_v43 }
  0x95   : > { %2987 = vmatprep.subr.bf16.mxu0 %v3228_v3  ;;  %2997 = vmatprep.mubr.bf16.mxu0 %v378_v13  ;;  %v364_v45 = vmax.f32 %v344_v38, 0.0  ;;  %v365_v46 = vmax.f32 %v345_v39, 0.0  ;;  %v2842_v48 = vunpack.c.h.bf16 %v2903_v43  ;;  %v2845_v51 = vunpack.c.l.bf16 %v2904_v44 }
  0x96   : > { %v366_v49 = vmax.f32 %v346_v41, 0.0  ;;  %v367_v50 = vmax.f32 %v347_v42, 0.0  ;;  %v2846_v52 = vunpack.c.h.bf16 %v2904_v44  ;;  %v348_v54 = vadd.f32 %v2841_v47, %v3788_v5 }
  0x97   : > { %v381_v53 = vpack.c.bf16 %v365_v46, %v364_v45  ;;  %v349_v55 = vadd.f32 %v2842_v48, %v3788_v5  ;;  %v350_v57 = vadd.f32 %v2845_v51, %v3788_v5  ;;  %v2849_v63 = vunpack.c.l.bf16 %v2905_v59 }
  0x98   : > { %2988 = vmatpush3.bf16.msra.mxu0 %v3228_v3  ;;  %v382_v56 = vpack.c.bf16 %v367_v50, %v366_v49  ;;  %v351_v58 = vadd.f32 %v2846_v52, %v3788_v5  ;;  %v368_v61 = vmax.f32 %v348_v54, 0.0  ;;  %v2850_v0 = vunpack.c.h.bf16 %v2905_v59 }
  0x99   : > { %2989 = vmatprep.subr.bf16.mxu0 %v3229_v10  ;;  %v369_v62 = vmax.f32 %v349_v55, 0.0  ;;  %v370_v1 = vmax.f32 %v350_v57, 0.0  ;;  %v2853_v3 = vunpack.c.l.bf16 %v2906_v60  ;;  %v2854_v4 = vunpack.c.h.bf16 %v2906_v60 }
  0x9a   : > { %v371_v2 = vmax.f32 %v351_v58, 0.0  ;;  %v352_v7 = vadd.f32 %v2849_v63, %v3788_v5  ;;  %v353_v8 = vadd.f32 %v2850_v0, %v3788_v5  ;;  %v2858_v16 = vunpack.c.h.bf16 %v2907_v12 }
  0x9b   : > { %v383_v6 = vpack.c.bf16 %v369_v62, %v368_v61  ;;  %v355_v11 = vadd.f32 %v2854_v4, %v3788_v5 }
  0x9c   : > { %2990 = vmatpush3.bf16.msra.mxu0 %v3229_v10  ;;  %v384_v9 = vpack.c.bf16 %v371_v2, %v370_v1  ;;  %v354_v10 = vadd.f32 %v2853_v3, %v3788_v5  ;;  %v372_v13 = vmax.f32 %v352_v7, 0.0  ;;  %v373_v14 = vmax.f32 %v353_v8, 0.0 }
  0x9d   : > { %2991 = vmatprep.subr.bf16.mxu0 %v3230_v15  ;;  %v375_v18 = vmax.f32 %v355_v11, 0.0 }
  0x9e   : > { %v374_v17 = vmax.f32 %v354_v10, 0.0  ;;  %v385_v19 = vpack.c.bf16 %v373_v14, %v372_v13 }
  0xa0   : > { %2992 = vmatpush3.bf16.msra.mxu0 %v3230_v15  ;;  %v2857_v15 = vunpack.c.l.bf16 %v2907_v12  ;;  %v386_v22 = vpack.c.bf16 %v375_v18, %v374_v17 }
  0xa1   : > { %2993 = vmatprep.subr.bf16.mxu0 %v3231_v21 }
  0xa2   : > { %v356_v20 = vadd.f32 %v2857_v15, %v3788_v5 }
  0xa4   : > { %2994 = vmatpush3.bf16.msra.mxu0 %v3231_v21  ;;  %v357_v21 = vadd.f32 %v2858_v16, %v3788_v5  ;;  %v376_v23 = vmax.f32 %v356_v20, 0.0 }
  0xa5   : > { %2995 = vmatprep.subr.bf16.mxu0 %v3232_v27 }
  0xa6   : > { %v377_v24 = vmax.f32 %v357_v21, 0.0 }
  0xa8   : > { %2996 = vmatpush3.bf16.msra.mxu0 %v3232_v27  ;;  %v387_v25 = vpack.c.bf16 %v377_v24, %v376_v23 }
  0xab   : > { %2998 = vmatmul.mubr.bf16.vlgmr.msra.gmra.mrb[0].mxu0 %v379_v37 }
  0xac   : > { %3001 = vmatprep.mubr.bf16.mxu0 %v380_v40 }
  0xb3   : > { %3002 = vmatmul.mubr.bf16.gmra.mrb[4].mxu0 %v381_v53 }
  0xb4   : > { %3005 = vmatprep.mubr.bf16.mxu0 %v382_v56 }
  0xbb   : > { %3006 = vmatmul.mubr.bf16.gmra.mrb[8].mxu0 %v383_v6 }
  0xbc   : > { %3009 = vmatprep.mubr.bf16.mxu0 %v384_v9 }
  0xc3   : > { %3010 = vmatmul.mubr.bf16.gmra.mrb[12].mxu0 %v385_v19 }
  0xc4   : > { %3013 = vmatprep.mubr.bf16.mxu0 %v386_v22 }
  0xcb   : > { %3014 = vmatmul.mubr.bf16.gmra.mrb[16].mxu0 %v387_v25 }
 0x17e   : > { %v2999_v27 = vpop.f32.mrb[0].mxu0 }
 0x17f   : > { %v502_v28 = vadd.f32 %v2999_v27, %v3822_v26  ;;  %v493_v29 = vpop.f32.mrb[1].mxu0 }
 0x180   : > { %v494_v30 = vadd.f32 %v3822_v26, %v493_v29  ;;  %v3000_v31 = vpop.f32.mrb[2].mxu0 }
 0x181   : > { %v505_v5 = vadd.f32 %v3000_v31, %v3822_v26  ;;  %v496_v32 = vpop.f32.mrb[3].mxu0  ;;  %v574_v34 = vmax.f32 %v502_v28, 0.0 }
 0x182   : > { %v497_v33 = vadd.f32 %v3822_v26, %v496_v32  ;;  %v572_v36 = vmax.f32 %v494_v30, 0.0 }
 0x183   : > { %v575_v35 = vmax.f32 %v505_v5, 0.0 }
 0x184   : > { %v573_v37 = vmax.f32 %v497_v33, 0.0  ;;  %v3526_v33 = vmov (!%p2707_p4), 0  }
 0x185   : > { %v593_v38 = vpack.c.bf16 %v575_v35, %v574_v34 }
 0x186   : > { %v592_v39 = vpack.c.bf16 %v573_v37, %v572_v36  ;;  %v3003_v40 = vpop.f32.mrb[4].mxu0 }
 0x187   : > { %603 = vst [vmem:[#allocation2 + $0x8] sm:$0xff] %v593_v38  ;;  %v518_v41 = vadd.f32 %v3003_v40, %v3822_v26  ;;  %v509_v42 = vpop.f32.mrb[5].mxu0 }
 0x188   : > { %602 = vst [vmem:[#allocation2] sm:$0xff] %v592_v39  ;;  %v510_v43 = vadd.f32 %v3822_v26, %v509_v42  ;;  %v3004_v44 = vpop.f32.mrb[6].mxu0 }
 0x189   : > { %v521_v45 = vadd.f32 %v3004_v44, %v3822_v26  ;;  %v512_v46 = vpop.f32.mrb[7].mxu0  ;;  %v578_v48 = vmax.f32 %v518_v41, 0.0  ;;  %616 = vst [vmem:[#allocation2] sm:$0xff] (!%p2707_p4), %v3526_v33 }
 0x18a   : > { %v513_v47 = vadd.f32 %v3822_v26, %v512_v46  ;;  %v576_v50 = vmax.f32 %v510_v43, 0.0 }
 0x18b   : > { %v579_v49 = vmax.f32 %v521_v45, 0.0 }
 0x18c   : > { %v577_v51 = vmax.f32 %v513_v47, 0.0 }
 0x18d   : > { %v595_v52 = vpack.c.bf16 %v579_v49, %v578_v48 }
 0x18e   : > { %v594_v53 = vpack.c.bf16 %v577_v51, %v576_v50  ;;  %v3007_v54 = vpop.f32.mrb[8].mxu0 }
 0x18f   : > { %605 = vst [vmem:[#allocation2 + $0x18] sm:$0xff] %v595_v52  ;;  %v534_v55 = vadd.f32 %v3007_v54, %v3822_v26  ;;  %v525_v56 = vpop.f32.mrb[9].mxu0 }
 0x190   : > { %604 = vst [vmem:[#allocation2 + $0x10] sm:$0xff] %v594_v53  ;;  %v526_v57 = vadd.f32 %v3822_v26, %v525_v56  ;;  %v3008_v58 = vpop.f32.mrb[10].mxu0 }
 0x191   : > { %v537_v59 = vadd.f32 %v3008_v58, %v3822_v26  ;;  %v528_v60 = vpop.f32.mrb[11].mxu0  ;;  %v582_v62 = vmax.f32 %v534_v55, 0.0 }
 0x192   : > { %v529_v61 = vadd.f32 %v3822_v26, %v528_v60  ;;  %v580_v0 = vmax.f32 %v526_v57, 0.0 }
 0x193   : > { %v583_v63 = vmax.f32 %v537_v59, 0.0 }
 0x194   : > { %v581_v1 = vmax.f32 %v529_v61, 0.0 }
 0x195   : > { %v597_v2 = vpack.c.bf16 %v583_v63, %v582_v62 }
 0x196   : > { %v596_v3 = vpack.c.bf16 %v581_v1, %v580_v0  ;;  %v3011_v4 = vpop.f32.mrb[12].mxu0 }
 0x197   : > { %607 = vst [vmem:[#allocation2 + $0x28] sm:$0xff] %v597_v2  ;;  %v550_v6 = vadd.f32 %v3011_v4, %v3822_v26  ;;  %v541_v7 = vpop.f32.mrb[13].mxu0 }
 0x198   : > { %606 = vst [vmem:[#allocation2 + $0x20] sm:$0xff] %v596_v3  ;;  %v542_v8 = vadd.f32 %v3822_v26, %v541_v7  ;;  %v3012_v9 = vpop.f32.mrb[14].mxu0 }
 0x199   : > { %v553_v10 = vadd.f32 %v3012_v9, %v3822_v26  ;;  %v544_v11 = vpop.f32.mrb[15].mxu0  ;;  %v586_v13 = vmax.f32 %v550_v6, 0.0 }
 0x19a   : > { %v545_v12 = vadd.f32 %v3822_v26, %v544_v11  ;;  %v584_v15 = vmax.f32 %v542_v8, 0.0 }
 0x19b   : > { %v587_v14 = vmax.f32 %v553_v10, 0.0 }
 0x19c   : > { %v585_v16 = vmax.f32 %v545_v12, 0.0 }
 0x19d   : > { %v599_v17 = vpack.c.bf16 %v587_v14, %v586_v13 }
 0x19e   : > { %v598_v18 = vpack.c.bf16 %v585_v16, %v584_v15  ;;  %v3015_v19 = vpop.f32.mrb[16].mxu0 }
 0x19f   : > { %609 = vst [vmem:[#allocation2 + $0x38] sm:$0xff] %v599_v17  ;;  %v566_v20 = vadd.f32 %v3015_v19, %v3822_v26  ;;  %v557_v21 = vpop.f32.mrb[17].mxu0 }
 0x1a0   : > { %608 = vst [vmem:[#allocation2 + $0x30] sm:$0xff] %v598_v18  ;;  %v558_v22 = vadd.f32 %v3822_v26, %v557_v21  ;;  %v3016_v23 = vpop.f32.mrb[18].mxu0 }
 0x1a1   : > { %v569_v24 = vadd.f32 %v3016_v23, %v3822_v26  ;;  %v560_v25 = vpop.f32.mrb[19].mxu0  ;;  %v590_v28 = vmax.f32 %v566_v20, 0.0 }
 0x1a2   : > { %v561_v27 = vadd.f32 %v3822_v26, %v560_v25  ;;  %v588_v30 = vmax.f32 %v558_v22, 0.0  ;;  %615 = sbr.rel (%p2707_p4) target bundleno = 425 (0x1a9), region = 56 }
 0x1a3   : > { %v591_v29 = vmax.f32 %v569_v24, 0.0 }
 0x1a4   : > { %v589_v31 = vmax.f32 %v561_v27, 0.0 }
 0x1a5   : > { %v601_v5 = vpack.c.bf16 %v591_v29, %v590_v28 }
 0x1a6   : > { %v600_v32 = vpack.c.bf16 %v589_v31, %v588_v30 }
 0x1a7   : > { %611 = vst [vmem:[#allocation2 + $0x48] sm:$0xff] %v601_v5 }
 0x1a8   : > { %610 = vst [vmem:[#allocation2 + $0x40] sm:$0xff] %v600_v32 }
 0x1a9 PF: > { %p2708_p10 = scmp.ne.s32.totalorder %s3501_s21, 1 }
 0x1aa   : > { %v3527_v26 = vmov (!%p2708_p10), 0  }
 0x1ab   : > { %620 = sbr.rel (%p2708_p10) target bundleno = 434 (0x1b2), region = 60  ;;  %621 = vst [vmem:[#allocation2 + $0x48] sm:$0xff] (!%p2708_p10), %v3527_v26 }
 0x1b2 PF: > { %v3233_v34 = vld [vmem:[#allocation8 + $0x4] ss:$12 sps:$4 sm:$0xff]   ;;  %v3235_v35 = vld [vmem:[#allocation8 + $0x8] ss:$12 sps:$4 sm:$0xff]   ;;  %v3528_v36 = vmov 0   ;;  %v3851_v62 = vld [vmem:[#allocation2 + $0x8] sm:$0xff] }
 0x1b3   : > { %1063 = vmatprep.mubr.bf16.mxu1 %v3528_v36  ;;  %1031 = vmatprep.subr.bf16.mxu1 %v3233_v34  ;;  %v3236_v37 = vld [vmem:[#allocation8] ss:$12 sps:$4 sm:$0xff]   ;;  %v3237_v38 = vld [vmem:[#allocation8 + $0x1c] ss:$12 sps:$4 sm:$0xff]   ;;  %v3240_v40 = vld [vmem:[#allocation8 + $0x18] ss:$12 sps:$4 sm:$0xff]  }
 0x1b4   : > { %3017 = vmatprep.subr.bf16.mxu0 %v3235_v35  ;;  %1032 = vmatpush1.bf16.msra.mxu1 %v3236_v37  ;;  %v3239_v39 = vld [vmem:[#allocation8 + $0x20] ss:$12 sps:$4 sm:$0xff]   ;;  %v3243_v42 = vld [vmem:[#allocation8 + $0x38] ss:$12 sps:$4 sm:$0xff]   ;;  %v3244_v43 = vld [vmem:[#allocation8 + $0x30] ss:$12 sps:$4 sm:$0xff]  }
 0x1b5   : > { %3018 = vmatpush3.bf16.msra.mxu0 %v3235_v35  ;;  %1033 = vmatprep.subr.bf16.mxu1 %v3237_v38  ;;  %v3241_v41 = vld [vmem:[#allocation8 + $0x34] ss:$12 sps:$4 sm:$0xff]   ;;  %v3245_v44 = vld [vmem:[#allocation8 + $0x4c] ss:$12 sps:$4 sm:$0xff]   ;;  %v3247_v45 = vld [vmem:[#allocation8 + $0x50] ss:$12 sps:$4 sm:$0xff]  }
 0x1b6   : > { %3019 = vmatprep.subr.bf16.mxu0 %v3239_v39  ;;  %v3248_v46 = vld [vmem:[#allocation8 + $0x48] ss:$12 sps:$4 sm:$0xff]   ;;  %v3249_v47 = vld [vmem:[#allocation8 + $0x64] ss:$12 sps:$4 sm:$0xff]   ;;  %v3252_v49 = vld [vmem:[#allocation8 + $0x60] ss:$12 sps:$4 sm:$0xff]  }
 0x1b7   : > { %v3251_v48 = vld [vmem:[#allocation8 + $0x68] ss:$12 sps:$4 sm:$0xff]   ;;  %v3255_v51 = vld [vmem:[#allocation8 + $0x80] ss:$12 sps:$4 sm:$0xff]   ;;  %v3256_v53 = vld [vmem:[#allocation8 + $0x78] ss:$12 sps:$4 sm:$0xff]  }
 0x1b8   : > { %1034 = vmatpush1.bf16.msra.mxu1 %v3240_v40  ;;  %v3253_v50 = vld [vmem:[#allocation8 + $0x7c] ss:$12 sps:$4 sm:$0xff]   ;;  %v863_v52 = vld [vmem:[#allocation2] sm:$0xff]  ;;  %v3259_v55 = vld [vmem:[#allocation8 + $0x98] ss:$12 sps:$4 sm:$0xff]   ;;  %s2798_s11 = sshll.u32 %s3501_s21, 4 }
 0x1b9   : > { %3020 = vmatpush3.bf16.msra.mxu0 %v3239_v39  ;;  %1035 = vmatprep.subr.bf16.mxu1 %v3241_v41  ;;  %v3257_v54 = vld [vmem:[#allocation8 + $0x94] ss:$12 sps:$4 sm:$0xff]   ;;  %v3260_v56 = vld [vmem:[#allocation8 + $0x90] ss:$12 sps:$4 sm:$0xff]   ;;  %v3261_v57 = vld [vmem:[#allocation8 + $0xac] ss:$12 sps:$4 sm:$0xff]  }
 0x1ba   : > { %3021 = vmatprep.subr.bf16.mxu0 %v3243_v42  ;;  %3033 = vmatprep.mubr.bf16.mxu0 %v863_v52  ;;  %v3263_v58 = vld [vmem:[#allocation8 + $0xb0] ss:$12 sps:$4 sm:$0xff]   ;;  %v3264_v59 = vld [vmem:[#allocation8 + $0xa8] ss:$12 sps:$4 sm:$0xff]   ;;  %v3265_v63 = vld [vmem:[#allocation8 + $0xc0] ss:$12 sps:$4 sm:$0xff]  }
 0x1bb   : > { %v3267_v60 = vld [vmem:[#allocation8 + $0xc4] ss:$12 sps:$4 sm:$0xff]   ;;  %v3268_v61 = vld [vmem:[#allocation8 + $0xc8] ss:$12 sps:$4 sm:$0xff]   ;;  %v3269_v0 = vld [vmem:[#allocation8 + $0xe0] ss:$12 sps:$4 sm:$0xff]  }
 0x1bc   : > { %1036 = vmatpush1.bf16.msra.mxu1 %v3244_v43  ;;  %v3272_v1 = vld [vmem:[#allocation8 + $0xdc] ss:$12 sps:$4 sm:$0xff]   ;;  %v3854_v2 = vld [vmem:[#allocation2 + $0x10] sm:$0xff]  ;;  %v3860_v9 = vld [vmem:[#allocation2 + $0x20] sm:$0xff]  ;;  %s2799_s16 = sshll.u32 %s3505_s22, 5  ;;  %s2577_s17 = sshll.u32 %s3846_s27, 4  ;;  %s4586_s17 = int_to_ptr.vmem [resolvable:$true] %s2577_s17 }
 0x1bd   : > { %3022 = vmatpush3.bf16.msra.mxu0 %v3243_v42  ;;  %1037 = vmatprep.subr.bf16.mxu1 %v3245_v44  ;;  %v3270_v3 = vld [vmem:[#allocation8 + $0xd8] ss:$12 sps:$4 sm:$0xff]   ;;  %v3277_v6 = vld [vmem:[#allocation8 + $0xf4] ss:$12 sps:$4 sm:$0xff]   ;;  %v3858_v7 = vld [vmem:[#allocation2 + $0x18] sm:$0xff]  ;;  %s2574_s21 = sadd.s32 %s2799_s16, %s2798_s11  ;;  %s2562_s6 = scalar_lea.sflag [#allocation5], %s3769_s10 }
 0x1be   : > { %3023 = vmatprep.subr.bf16.mxu0 %v3247_v45  ;;  %v3273_v4 = vld [vmem:[#allocation8 + $0xf8] ss:$12 sps:$4 sm:$0xff]   ;;  %v3274_v8 = vld [vmem:[#allocation8 + $0x110] ss:$12 sps:$4 sm:$0xff]   ;;  %v3278_v12 = vld [vmem:[#allocation8 + $0x128] ss:$12 sps:$4 sm:$0xff]  }
 0x1bf   : > { %v3275_v10 = vld [vmem:[#allocation8 + $0xf0] ss:$12 sps:$4 sm:$0xff]   ;;  %v3282_v11 = vld [vmem:[#allocation8 + $0x10c] ss:$12 sps:$4 sm:$0xff]   ;;  %v3280_v13 = vld [vmem:[#allocation8 + $0x108] ss:$12 sps:$4 sm:$0xff]  }
 0x1c0   : > { %1038 = vmatpush1.bf16.msra.mxu1 %v3248_v46  ;;  %v3866_v14 = vld [vmem:[#allocation2 + $0x28] sm:$0xff]  ;;  %v3279_v15 = vld [vmem:[#allocation8 + $0x140] ss:$12 sps:$4 sm:$0xff]   ;;  %v3287_v17 = vld [vmem:[#allocation8 + $0x124] ss:$12 sps:$4 sm:$0xff]   ;;  %s2800_s22 = sshll.u32 %s2574_s21, 6 }
 0x1c1   : > { %3024 = vmatpush3.bf16.msra.mxu0 %v3247_v45  ;;  %1039 = vmatprep.subr.bf16.mxu1 %v3249_v47  ;;  %v3868_v16 = vld [vmem:[#allocation2 + $0x30] sm:$0xff]  ;;  %v3296_v19 = vld [vmem:[#allocation8 + $0x13c] ss:$12 sps:$4 sm:$0xff]   ;;  %v3314_v30 = vld [vmem:[#allocation8 + $0x16c] ss:$12 sps:$4 sm:$0xff]   ;;  %s4584_s18 = scalar_lea.hbm %s4648_s5, %s2800_s22  ;;  %s3415_s14 = scalar_lea.vmem %s4586_s17, 1024 }
 0x1c2   : > { %3025 = vmatprep.subr.bf16.mxu0 %v3251_v48  ;;  %v3285_v18 = vld [vmem:[#allocation8 + $0x120] ss:$12 sps:$4 sm:$0xff]   ;;  %v3283_v20 = vld [vmem:[#allocation8 + $0x158] ss:$12 sps:$4 sm:$0xff]   ;;  %v3284_v22 = vld [vmem:[#allocation8 + $0x170] ss:$12 sps:$4 sm:$0xff]   ;;  %p3416_p6 = scmp.ne.s32.totalorder %s4586_s17, %s3415_s14 }
 0x1c3   : > { %v3874_v21 = vld [vmem:[#allocation2 + $0x38] sm:$0xff]  ;;  %v3294_v23 = vld [vmem:[#allocation8 + $0x138] ss:$12 sps:$4 sm:$0xff]   ;;  %v3305_v24 = vld [vmem:[#allocation8 + $0x154] ss:$12 sps:$4 sm:$0xff]   ;;  %s3529_s15 = smov [#allocation9]  }
 0x1c4   : > { %1040 = vmatpush1.bf16.msra.mxu1 %v3252_v49  ;;  %v3290_v25 = vld [vmem:[#allocation8 + $0x184] ss:$12 sps:$4 sm:$0xff]   ;;  %v3288_v28 = vld [vmem:[#allocation8 + $0x180] ss:$12 sps:$4 sm:$0xff]   ;;  %v3293_v29 = vld [vmem:[#allocation8 + $0x19c] ss:$12 sps:$4 sm:$0xff]   ;;  %p3417_p11 = pnand %p3416_p6, %p3707_p8 }
 0x1c5   : > { %3026 = vmatpush3.bf16.msra.mxu0 %v3251_v48  ;;  %1041 = vmatprep.subr.bf16.mxu1 %v3253_v50  ;;  %v3303_v27 = vld [vmem:[#allocation8 + $0x150] ss:$12 sps:$4 sm:$0xff]   ;;  %v3312_v31 = vld [vmem:[#allocation8 + $0x168] ss:$12 sps:$4 sm:$0xff]   ;;  %v3291_v5 = vld [vmem:[#allocation8 + $0x198] ss:$12 sps:$4 sm:$0xff]  }
 0x1c6   : > { %3027 = vmatprep.subr.bf16.mxu0 %v3255_v51  ;;  %v3321_v32 = vld [vmem:[#allocation8 + $0x188] ss:$12 sps:$4 sm:$0xff]   ;;  %v3297_v26 = vld [vmem:[#allocation8 + $0x1b0] ss:$12 sps:$4 sm:$0xff]   ;;  %v3302_v34 = vld [vmem:[#allocation8 + $0x1cc] ss:$12 sps:$4 sm:$0xff]   ;;  %p3418_p13 = pneg %p3417_p11 }
 0x1c7   : > { %v3299_v33 = vld [vmem:[#allocation8 + $0x1b4] ss:$12 sps:$4 sm:$0xff]   ;;  %v3308_v37 = vld [vmem:[#allocation8 + $0x1e4] ss:$12 sps:$4 sm:$0xff]   ;;  %v3311_v39 = vld [vmem:[#allocation8 + $0x1fc] ss:$12 sps:$4 sm:$0xff]  }
 0x1c8   : > { %1042 = vmatpush1.bf16.msra.mxu1 %v3256_v53  ;;  %v3300_v35 = vld [vmem:[#allocation8 + $0x1c8] ss:$12 sps:$4 sm:$0xff]   ;;  %v3306_v38 = vld [vmem:[#allocation8 + $0x1e0] ss:$12 sps:$4 sm:$0xff]   ;;  %v3309_v40 = vld [vmem:[#allocation8 + $0x1f8] ss:$12 sps:$4 sm:$0xff]  }
 0x1c9   : > { %3028 = vmatpush3.bf16.msra.mxu0 %v3255_v51  ;;  %1043 = vmatprep.subr.bf16.mxu1 %v3257_v54  ;;  %v3317_v41 = vld [vmem:[#allocation8 + $0x214] ss:$12 sps:$4 sm:$0xff]   ;;  %v3315_v43 = vld [vmem:[#allocation8 + $0x210] ss:$12 sps:$4 sm:$0xff]   ;;  %v3320_v44 = vld [vmem:[#allocation8 + $0x22c] ss:$12 sps:$4 sm:$0xff]  }
 0x1ca   : > { %3029 = vmatprep.subr.bf16.mxu0 %v3259_v55  ;;  %v3892_v42 = vld [vmem:[#allocation2 + $0x40] sm:$0xff]  ;;  %v3322_v46 = vld [vmem:[#allocation8 + $0x1a0] ss:$12 sps:$4 sm:$0xff]   ;;  %v3323_v47 = vld [vmem:[#allocation8 + $0x1b8] ss:$12 sps:$4 sm:$0xff]   ;;  %s3419_s4 = sshll.u32 %s3529_s15, 4  ;;  %s3420_s4 = int_to_ptr.vmem [resolvable:$false] %s3419_s4 }
 0x1cb   : > { %v3318_v45 = vld [vmem:[#allocation8 + $0x228] ss:$12 sps:$4 sm:$0xff]   ;;  %v3324_v48 = vld [vmem:[#allocation8 + $0x1d0] ss:$12 sps:$4 sm:$0xff]   ;;  %v3326_v50 = vld [vmem:[#allocation8 + $0x200] ss:$12 sps:$4 sm:$0xff]   ;;  %p3422_p3 = scmp.lt.s32.totalorder %s4586_s17, %s3420_s4 }
 0x1cc   : > { %1044 = vmatpush1.bf16.msra.mxu1 %v3260_v56  ;;  %v3325_v49 = vld [vmem:[#allocation8 + $0x1e8] ss:$12 sps:$4 sm:$0xff]   ;;  %v3327_v51 = vld [vmem:[#allocation8 + $0x218] ss:$12 sps:$4 sm:$0xff]   ;;  %s3421_s26 = scalar_lea.vmem %s3420_s4, 2048 }
 0x1cd   : > { %3030 = vmatpush3.bf16.msra.mxu0 %v3259_v55  ;;  %1045 = vmatprep.subr.bf16.mxu1 %v3261_v57  ;;  %v1965_v53 = vld [vmem:[#allocation2 + $0x48] sm:$0xff]  ;;  %p3423_p7 = scmp.lt.s32.totalorder %s3421_s26, %s3415_s14 }
 0x1ce   : > { %3031 = vmatprep.subr.bf16.mxu0 %v3263_v58 }
 0x1cf   : > { %p3424_p12 = por %p3423_p7, %p3422_p3 }
 0x1d0   : > { %1046 = vmatpush1.bf16.msra.mxu1 %v3264_v59 }
 0x1d1   : > { %3032 = vmatpush3.bf16.msra.mxu0 %v3263_v58  ;;  %1604 = vmatprep.subr.bf16.mxu1 %v3267_v60  ;;  %p3425_p1 = pnand %p3424_p12, %p3418_p13 }
 0x1d2   : > { %3049 = vmatprep.subr.bf16.mxu0 %v3268_v61 }
 0x1d3   : > { %1064 = vmatmul.mubr.bf16.vlgmr.msra.gmra.mrb[0].mxu1 %v863_v52  ;;  %v3328_v52 = vld [vmem:[#allocation8 + $0x230] ss:$12 sps:$4 sm:$0xff]  }
 0x1d4   : > { %3034 = vmatmul.mubr.bf16.vlgmr.msra.gmra.mrb[20].mxu0 %v3851_v62  ;;  %1605 = vmatpush1.bf16.msra.mxu1 %v3265_v63 }
 0x1d5   : > { %3050 = vmatpush3.bf16.msra.mxu0 %v3268_v61  ;;  %1073 = vmatprep.mubr.bf16.mxu1 %v3528_v36 }
 0x1d6   : > { %3051 = vmatprep.subr.bf16.mxu0 %v3269_v0  ;;  %3037 = vmatprep.mubr.bf16.mxu0 %v3854_v2 }
 0x1d7   : > { %1606 = vmatprep.subr.bf16.mxu1 %v3272_v1 }
 0x1d8   : > { %1607 = vmatpush1.bf16.msra.mxu1 %v3270_v3 }
 0x1d9   : > { %3052 = vmatpush3.bf16.msra.mxu0 %v3269_v0  ;;  %1608 = vmatprep.subr.bf16.mxu1 %v3277_v6 }
 0x1da   : > { %3053 = vmatprep.subr.bf16.mxu0 %v3273_v4 }
 0x1db   : > { %1074 = vmatmul.mubr.bf16.gmra.mrb[4].mxu1 %v3851_v62 }
 0x1dc   : > { %3038 = vmatmul.mubr.bf16.gmra.mrb[24].mxu0 %v3858_v7  ;;  %1083 = vmatprep.mubr.bf16.mxu1 %v3528_v36 }
 0x1dd   : > { %3054 = vmatpush3.bf16.msra.mxu0 %v3273_v4  ;;  %3041 = vmatprep.mubr.bf16.mxu0 %v3860_v9 }
 0x1de   : > { %3055 = vmatprep.subr.bf16.mxu0 %v3274_v8  ;;  %1609 = vmatpush1.bf16.msra.mxu1 %v3275_v10 }
 0x1df   : > { %1610 = vmatprep.subr.bf16.mxu1 %v3282_v11 }
 0x1e1   : > { %3056 = vmatpush3.bf16.msra.mxu0 %v3274_v8 }
 0x1e2   : > { %3057 = vmatprep.subr.bf16.mxu0 %v3278_v12  ;;  %1611 = vmatpush1.bf16.msra.mxu1 %v3280_v13 }
 0x1e3   : > { %1084 = vmatmul.mubr.bf16.gmra.mrb[8].mxu1 %v3854_v2  ;;  %1612 = vmatprep.subr.bf16.mxu1 %v3287_v17 }
 0x1e4   : > { %3042 = vmatmul.mubr.bf16.gmra.mrb[28].mxu0 %v3866_v14  ;;  %1093 = vmatprep.mubr.bf16.mxu1 %v3528_v36 }
 0x1e5   : > { %3058 = vmatpush3.bf16.msra.mxu0 %v3278_v12  ;;  %3045 = vmatprep.mubr.bf16.mxu0 %v3868_v16 }
 0x1e6   : > { %3059 = vmatprep.subr.bf16.mxu0 %v3279_v15  ;;  %1613 = vmatpush1.bf16.msra.mxu1 %v3285_v18 }
 0x1e7   : > { %1614 = vmatprep.subr.bf16.mxu1 %v3296_v19 }
 0x1e9   : > { %3060 = vmatpush3.bf16.msra.mxu0 %v3279_v15 }
 0x1ea   : > { %3061 = vmatprep.subr.bf16.mxu0 %v3283_v20  ;;  %1615 = vmatpush1.bf16.msra.mxu1 %v3294_v23 }
 0x1eb   : > { %1094 = vmatmul.mubr.bf16.gmra.mrb[12].mxu1 %v3858_v7  ;;  %1616 = vmatprep.subr.bf16.mxu1 %v3305_v24 }
 0x1ec   : > { %3046 = vmatmul.mubr.bf16.gmra.mrb[32].mxu0 %v3874_v21  ;;  %1103 = vmatprep.mubr.bf16.mxu1 %v3528_v36 }
 0x1ed   : > { %3062 = vmatpush3.bf16.msra.mxu0 %v3283_v20  ;;  %3065 = vmatprep.mubr.bf16.mxu0 %v3851_v62 }
 0x1ee   : > { %3063 = vmatprep.subr.bf16.mxu0 %v3284_v22  ;;  %1617 = vmatpush1.bf16.msra.mxu1 %v3303_v27 }
 0x1ef   : > { %1618 = vmatprep.subr.bf16.mxu1 %v3314_v30 }
 0x1f1   : > { %3064 = vmatpush3.bf16.msra.mxu0 %v3284_v22 }
 0x1f2   : > { %2127 = vmatprep.subr.bf16.mxu0 %v3290_v25  ;;  %1619 = vmatpush1.bf16.msra.mxu1 %v3312_v31 }
 0x1f3   : > { %1104 = vmatmul.mubr.bf16.gmra.mrb[16].mxu1 %v3860_v9  ;;  %3081 = vmatprep.subr.bf16.mxu1 %v3321_v32 }
 0x1f4   : > { %3066 = vmatmul.mubr.bf16.vlgmr.msra.gmra.mrb[36].mxu0 %v3854_v2  ;;  %1113 = vmatprep.mubr.bf16.mxu1 %v3528_v36 }
 0x1f5   : > { %2128 = vmatpush1.bf16.msra.mxu0 %v3288_v28  ;;  %3069 = vmatprep.mubr.bf16.mxu0 %v3858_v7 }
 0x1f6   : > { %2129 = vmatprep.subr.bf16.mxu0 %v3293_v29 }
 0x1f9   : > { %2130 = vmatpush1.bf16.msra.mxu0 %v3291_v5 }
 0x1fa   : > { %2131 = vmatprep.subr.bf16.mxu0 %v3299_v33 }
 0x1fb   : > { %1114 = vmatmul.mubr.bf16.gmra.mrb[20].mxu1 %v3866_v14 }
 0x1fc   : > { %3070 = vmatmul.mubr.bf16.gmra.mrb[40].mxu0 %v3860_v9  ;;  %1123 = vmatprep.mubr.bf16.mxu1 %v3528_v36 }
 0x1fd   : > { %2132 = vmatpush1.bf16.msra.mxu0 %v3297_v26  ;;  %3073 = vmatprep.mubr.bf16.mxu0 %v3866_v14 }
 0x1fe   : > { %2133 = vmatprep.subr.bf16.mxu0 %v3302_v34 }
 0x201   : > { %2134 = vmatpush1.bf16.msra.mxu0 %v3300_v35 }
 0x202   : > { %2135 = vmatprep.subr.bf16.mxu0 %v3308_v37 }
 0x203   : > { %1124 = vmatmul.mubr.bf16.gmra.mrb[24].mxu1 %v3868_v16 }
 0x204   : > { %3074 = vmatmul.mubr.bf16.gmra.mrb[44].mxu0 %v3868_v16  ;;  %1133 = vmatprep.mubr.bf16.mxu1 %v3528_v36 }
 0x205   : > { %2136 = vmatpush1.bf16.msra.mxu0 %v3306_v38  ;;  %3077 = vmatprep.mubr.bf16.mxu0 %v3874_v21 }
 0x206   : > { %2137 = vmatprep.subr.bf16.mxu0 %v3311_v39 }
 0x209   : > { %2138 = vmatpush1.bf16.msra.mxu0 %v3309_v40 }
 0x20a   : > { %2139 = vmatprep.subr.bf16.mxu0 %v3317_v41 }
 0x20b   : > { %1134 = vmatmul.mubr.bf16.gmra.mrb[28].mxu1 %v3874_v21 }
 0x20c   : > { %3078 = vmatmul.mubr.bf16.gmra.mrb[48].mxu0 %v3892_v42  ;;  %1636 = vmatprep.mubr.bf16.mxu1 %v3528_v36 }
 0x20d   : > { %2140 = vmatpush1.bf16.msra.mxu0 %v3315_v43  ;;  %2159 = vmatprep.mubr.bf16.mxu0 %v3528_v36 }
 0x20e   : > { %2141 = vmatprep.subr.bf16.mxu0 %v3320_v44 }
 0x211   : > { %2142 = vmatpush1.bf16.msra.mxu0 %v3318_v45 }
 0x213   : > { %1637 = vmatmul.mubr.bf16.vlgmr.msra.gmra.mrb[32].mxu1 %v3851_v62 }
 0x214   : > { %2160 = vmatmul.mubr.bf16.vlgmr.msra.gmra.mrb[52].mxu0 %v3854_v2  ;;  %3082 = vmatpush3.bf16.msra.mxu1 %v3321_v32 }
 0x215   : > { %1646 = vmatprep.mubr.bf16.mxu1 %v3528_v36  ;;  %2169 = vmatprep.mubr.bf16.mxu0 %v3528_v36 }
 0x216   : > { %3083 = vmatprep.subr.bf16.mxu1 %v3322_v46 }
 0x218   : > { %3084 = vmatpush3.bf16.msra.mxu1 %v3322_v46 }
 0x219   : > { %3085 = vmatprep.subr.bf16.mxu1 %v3323_v47 }
 0x21b   : > { %1647 = vmatmul.mubr.bf16.gmra.mrb[36].mxu1 %v3854_v2 }
 0x21c   : > { %2170 = vmatmul.mubr.bf16.gmra.mrb[56].mxu0 %v3858_v7  ;;  %1656 = vmatprep.mubr.bf16.mxu1 %v3528_v36 }
 0x21d   : > { %2179 = vmatprep.mubr.bf16.mxu0 %v3528_v36  ;;  %3086 = vmatpush3.bf16.msra.mxu1 %v3323_v47 }
 0x21e   : > { %3087 = vmatprep.subr.bf16.mxu1 %v3324_v48 }
 0x221   : > { %3088 = vmatpush3.bf16.msra.mxu1 %v3324_v48 }
 0x222   : > { %3089 = vmatprep.subr.bf16.mxu1 %v3325_v49 }
 0x223   : > { %1657 = vmatmul.mubr.bf16.gmra.mrb[40].mxu1 %v3858_v7 }
 0x224   : > { %2180 = vmatmul.mubr.bf16.gmra.mrb[60].mxu0 %v3860_v9  ;;  %1666 = vmatprep.mubr.bf16.mxu1 %v3528_v36 }
 0x225   : > { %2189 = vmatprep.mubr.bf16.mxu0 %v3528_v36  ;;  %3090 = vmatpush3.bf16.msra.mxu1 %v3325_v49 }
 0x226   : > { %3091 = vmatprep.subr.bf16.mxu1 %v3326_v50 }
 0x229   : > { %3092 = vmatpush3.bf16.msra.mxu1 %v3326_v50 }
 0x22a   : > { %3093 = vmatprep.subr.bf16.mxu1 %v3327_v51 }
 0x22b   : > { %1667 = vmatmul.mubr.bf16.gmra.mrb[44].mxu1 %v3860_v9 }
 0x22c   : > { %2190 = vmatmul.mubr.bf16.gmra.mrb[64].mxu0 %v3866_v14  ;;  %1676 = vmatprep.mubr.bf16.mxu1 %v3528_v36 }
 0x22d   : > { %2199 = vmatprep.mubr.bf16.mxu0 %v3528_v36  ;;  %3094 = vmatpush3.bf16.msra.mxu1 %v3327_v51 }
 0x22e   : > { %3095 = vmatprep.subr.bf16.mxu1 %v3328_v52 }
 0x231   : > { %3096 = vmatpush3.bf16.msra.mxu1 %v3328_v52 }
 0x233   : > { %1677 = vmatmul.mubr.bf16.gmra.mrb[48].mxu1 %v3866_v14 }
 0x234   : > { %2200 = vmatmul.mubr.bf16.gmra.mrb[68].mxu0 %v3868_v16  ;;  %1686 = vmatprep.mubr.bf16.mxu1 %v3528_v36 }
 0x235   : > { %2209 = vmatprep.mubr.bf16.mxu0 %v3528_v36 }
 0x23b   : > { %1687 = vmatmul.mubr.bf16.gmra.mrb[52].mxu1 %v3868_v16 }
 0x23c   : > { %2210 = vmatmul.mubr.bf16.gmra.mrb[72].mxu0 %v3874_v21  ;;  %1696 = vmatprep.mubr.bf16.mxu1 %v3528_v36 }
 0x23d   : > { %2219 = vmatprep.mubr.bf16.mxu0 %v3528_v36 }
 0x243   : > { %1697 = vmatmul.mubr.bf16.gmra.mrb[56].mxu1 %v3874_v21 }
 0x244   : > { %2220 = vmatmul.mubr.bf16.gmra.mrb[76].mxu0 %v3892_v42  ;;  %1706 = vmatprep.mubr.bf16.mxu1 %v3528_v36 }
 0x245   : > { %2229 = vmatprep.mubr.bf16.mxu0 %v3528_v36  ;;  %v622_v36 = vlaneseq }
 0x247   : > { %v3934_v54 = vshrl.u32 %v622_v36, 7 }
 0x249   : > { %v624_v55 = vadd.s32 8, %v3934_v54  ;;  %v625_v61 = vadd.s32 16, %v3934_v54  ;;  %vm4671_vm0 = vcmp.lt.s32.totalorder %v3934_v54, 1  ;;  %vm4662_vm1 = vcmp.lt.s32.totalorder %v3934_v54, 7 }
 0x24a   : > { %v628_v32 = vadd.s32 40, %v3934_v54  ;;  %v629_v52 = vadd.s32 48, %v3934_v54 }
 0x24b   : > { %1707 = vmatmul.mubr.bf16.gmra.mrb[60].mxu1 %v3892_v42  ;;  %v650_v58 = vand.u32 15, %v624_v55  ;;  %v657_v12 = vand.u32 15, %v625_v61 }
 0x24c   : > { %2230 = vmatmul.mubr.bf16.gmra.mrb[80].mxu0 %v1965_v53  ;;  %3097 = vmatprep.mubr.bf16.mxu1 %v3854_v2  ;;  %v626_v2 = vadd.s32 24, %v3934_v54  ;;  %v678_v49 = vand.u32 15, %v628_v32 }
 0x24d   : > { %vm3949_vm2 = vcmp.lt.s32.totalorder %v650_v58, 15  ;;  %vm3972_vm3 = vcmp.gt.s32.totalorder %v657_v12, 0 }
 0x24e   : > { %v664_v17 = vand.u32 15, %v626_v2  ;;  %vm4008_vm6 = vcmp.lt.s32.totalorder %v678_v49, 15 }
 0x250   : > { %vm3976_vm4 = vcmp.lt.s32.totalorder %v664_v17, 15 }
 0x253   : > { %3098 = vmatmul.mubr.bf16.vlgmr.msra.gmra.mrb[64].mxu1 %v3858_v7 }
 0x254   : > { %3101 = vmatprep.mubr.bf16.mxu1 %v3860_v9 }
 0x25b   : > { %3102 = vmatmul.mubr.bf16.gmra.mrb[68].mxu1 %v3866_v14 }
 0x25c   : > { %3105 = vmatprep.mubr.bf16.mxu1 %v3868_v16 }
 0x263   : > { %3106 = vmatmul.mubr.bf16.gmra.mrb[72].mxu1 %v3874_v21  ;;  %v627_v21 = vadd.s32 32, %v3934_v54 }
 0x264   : > { %3109 = vmatprep.mubr.bf16.mxu1 %v3892_v42 }
 0x265   : > { %v671_v40 = vand.u32 15, %v627_v21 }
 0x267   : > { %vm4004_vm5 = vcmp.gt.s32.totalorder %v671_v40, 0 }
 0x26b   : > { %3110 = vmatmul.mubr.bf16.gmra.mrb[76].mxu1 %v1965_v53 }
 0x2a6   : > { %v3937_v56 = vpop.f32.mrb[0].mxu1 }
 0x2a7   : > { %v3035_v57 = vpop.f32.mrb[20].mxu0  ;;  %v3939_v59 = vpop.f32.mrb[1].mxu1  ;;  %v4661_v3 = vrot.slane %v3937_v56, 7 }
 0x2a8   : > { %v3941_v60 = vpop.f32.mrb[21].mxu0  ;;  %v1324_v62 = vrot.slane %v3035_v57, 1  ;;  %v1069_v0 = vpop.f32.mrb[2].mxu1 }
 0x2a9   : > { %v1322_v63 = vrot.slane %v3941_v60, 1  ;;  %v3036_v1 = vpop.f32.mrb[22].mxu0  ;;  %v1242_v4 = vrot.slane %v1069_v0, 7  ;;  %v1071_v7 = vpop.f32.mrb[3].mxu1 }
 0x2aa   : > { %v1325_v6 = vrot.slane %v3036_v1, 1  ;;  %v1181_v8 = vpop.f32.mrb[23].mxu0 }
 0x2ab   : > { %v1323_v9 = vrot.slane %v1181_v8, 1  ;;  %v1272_v11 = vsel %vm4671_vm0, %v4661_v3, %v1242_v4 }
 0x2ac   : > { %v1351_v13 = vsel %vm4662_vm1, %v1324_v62, %v1325_v6  ;;  %v1404_v14 = vadd.f32 %v1272_v11, %v1071_v7 }
 0x2ad   : > { %v1352_v15 = vsel %vm4662_vm1, %v1323_v9, %v1324_v62  ;;  %v3965_v16 = vsel %vm4662_vm1, %v1322_v63, %v1323_v9 }
 0x2ae   : > { %v1388_v18 = vsel %vm3949_vm2, %v1352_v15, 0.0  ;;  %v1075_v19 = vpop.f32.mrb[4].mxu1 }
 0x2af   : > { %v3039_v20 = vpop.f32.mrb[24].mxu0  ;;  %v3970_v22 = vadd.f32 %v1404_v14, %v1388_v18  ;;  %v1243_v23 = vrot.slane %v1075_v19, 7  ;;  %v1077_v25 = vpop.f32.mrb[5].mxu1  ;;  %v685_v14 = vand.u32 15, %v629_v52 }
 0x2b0   : > { %v1194_v27 = vpop.f32.mrb[25].mxu0  ;;  %v1079_v28 = vpop.f32.mrb[6].mxu1  ;;  %v1328_v29 = vrot.slane %v3039_v20, 1 }
 0x2b1   : > { %v1326_v30 = vrot.slane %v1194_v27, 1  ;;  %v3040_v31 = vpop.f32.mrb[26].mxu0  ;;  %v1271_v33 = vsel %vm4671_vm0, %v1242_v4, %v1243_v23  ;;  %v1244_v26 = vrot.slane %v1079_v28, 7  ;;  %v1081_v34 = vpop.f32.mrb[7].mxu1  ;;  %vm4041_vm7 = vcmp.gt.s32.totalorder %v685_v14, 0 }
 0x2b2   : > { %v1329_v35 = vrot.slane %v3040_v31, 1  ;;  %v1197_v37 = vpop.f32.mrb[27].mxu0  ;;  %v1308_v38 = vsel %vm3972_vm3, %v1271_v33, 0.0  ;;  %v632_v33 = vadd.s32 72, %v3934_v54 }
 0x2b3   : > { %v1350_v39 = vsel %vm4662_vm1, %v1325_v6, %v1326_v30  ;;  %v1327_v41 = vrot.slane %v1197_v37, 1  ;;  %v1405_v42 = vadd.f32 %v1308_v38, %v1077_v25  ;;  %v1270_v43 = vsel %vm4671_vm0, %v1243_v23, %v1244_v26 }
 0x2b4   : > { %v3991_v44 = vsel %vm4662_vm1, %v1328_v29, %v1329_v35  ;;  %v1390_v45 = vsel %vm3976_vm4, %v1350_v39, 0.0  ;;  %v1406_v46 = vadd.f32 %v1270_v43, %v1081_v34  ;;  %v630_v6 = vadd.s32 56, %v3934_v54 }
 0x2b5   : > { %v1348_v47 = vsel %vm4662_vm1, %v1327_v41, %v1328_v29  ;;  %v1349_v48 = vsel %vm4662_vm1, %v1326_v30, %v1327_v41  ;;  %v3999_v50 = vadd.f32 %v1405_v42, %v1351_v13  ;;  %v631_v30 = vadd.s32 64, %v3934_v54 }
 0x2b6   : > { %v1085_v51 = vpop.f32.mrb[8].mxu1  ;;  %v4002_v36 = vadd.f32 %v1406_v46, %v1390_v45  ;;  %v1392_v21 = vsel %vm4008_vm6, %v1348_v47, 0.0  ;;  %v692_v28 = vand.u32 15, %v630_v6 }
 0x2b7   : > { %v3043_v53 = vpop.f32.mrb[28].mxu0  ;;  %v1245_v55 = vrot.slane %v1085_v51, 7  ;;  %v1087_v58 = vpop.f32.mrb[9].mxu1  ;;  %v699_v49 = vand.u32 15, %v631_v30 }
 0x2b8   : > { %v1210_v61 = vpop.f32.mrb[29].mxu0  ;;  %v1089_v62 = vpop.f32.mrb[10].mxu1  ;;  %v1332_v0 = vrot.slane %v3043_v53, 1  ;;  %vm4045_vm8 = vcmp.lt.s32.totalorder %v692_v28, 15  ;;  %v706_v53 = vand.u32 15, %v632_v33 }
 0x2b9   : > { %v1330_v1 = vrot.slane %v1210_v61, 1  ;;  %v3044_v2 = vpop.f32.mrb[30].mxu0  ;;  %v1269_v7 = vsel %vm4671_vm0, %v1244_v26, %v1245_v55  ;;  %v1246_v8 = vrot.slane %v1089_v62, 7  ;;  %v1091_v9 = vpop.f32.mrb[11].mxu1  ;;  %vm4085_vm9 = vcmp.gt.s32.totalorder %v699_v49, 0 }
 0x2ba   : > { %v1333_v11 = vrot.slane %v3044_v2, 1  ;;  %v1213_v12 = vpop.f32.mrb[31].mxu0  ;;  %v1310_v13 = vsel %vm4004_vm5, %v1269_v7, 0.0  ;;  %vm4091_vm10 = vcmp.lt.s32.totalorder %v706_v53, 15  ;;  %v635_v53 = vadd.s32 96, %v3934_v54 }
 0x2bb   : > { %v1346_v15 = vsel %vm4662_vm1, %v1329_v35, %v1330_v1  ;;  %v1331_v17 = vrot.slane %v1213_v12, 1  ;;  %v1407_v18 = vadd.f32 %v1310_v13, %v1087_v58  ;;  %v1268_v19 = vsel %vm4671_vm0, %v1245_v55, %v1246_v8 }
 0x2bc   : > { %v4023_v20 = vsel %vm4662_vm1, %v1332_v0, %v1333_v11  ;;  %v1408_v23 = vadd.f32 %v1268_v19, %v1091_v9  ;;  %v633_v12 = vadd.s32 80, %v3934_v54 }
 0x2bd   : > { %v4029_v25 = vsel %vm4662_vm1, %v1330_v1, %v1331_v17  ;;  %v4033_v27 = vsel %vm4662_vm1, %v1331_v17, %v1332_v0  ;;  %v4035_v29 = vadd.f32 %v1407_v18, %v1349_v48  ;;  %v1394_v1 = vsel %vm4045_vm8, %v1346_v15, 0.0 }
 0x2be   : > { %v1095_v31 = vpop.f32.mrb[12].mxu1  ;;  %v4039_v26 = vadd.f32 %v1408_v23, %v1392_v21 }
 0x2bf   : > { %v3047_v32 = vpop.f32.mrb[32].mxu0  ;;  %v1247_v34 = vrot.slane %v1095_v31, 7  ;;  %v1097_v37 = vpop.f32.mrb[13].mxu1 }
 0x2c0   : > { %v1226_v38 = vpop.f32.mrb[33].mxu0  ;;  %v1099_v39 = vpop.f32.mrb[14].mxu1  ;;  %v1336_v40 = vrot.slane %v3047_v32, 1 }
 0x2c1   : > { %v1334_v41 = vrot.slane %v1226_v38, 1  ;;  %v3048_v42 = vpop.f32.mrb[34].mxu0  ;;  %v1267_v45 = vsel %vm4671_vm0, %v1246_v8, %v1247_v34  ;;  %v1248_v46 = vrot.slane %v1099_v39, 7  ;;  %v1101_v47 = vpop.f32.mrb[15].mxu1  ;;  %v713_v38 = vand.u32 15, %v633_v12 }
 0x2c2   : > { %v1337_v48 = vrot.slane %v3048_v42, 1  ;;  %v1229_v51 = vpop.f32.mrb[35].mxu0  ;;  %v1312_v52 = vsel %vm4041_vm7, %v1267_v45, 0.0  ;;  %v1396_v42 = vsel %vm4091_vm10, %v4033_v27, 0.0 }
 0x2c3   : > { %v4055_v55 = vsel %vm4662_vm1, %v1333_v11, %v1334_v41  ;;  %v1335_v58 = vrot.slane %v1229_v51, 1  ;;  %v1409_v61 = vadd.f32 %v1312_v52, %v1097_v37  ;;  %v1266_v62 = vsel %vm4671_vm0, %v1247_v34, %v1248_v46 }
 0x2c4   : > { %v4061_v0 = vsel %vm4662_vm1, %v1336_v40, %v1337_v48  ;;  %v1410_v2 = vadd.f32 %v1266_v62, %v1101_v47  ;;  %v4077_v8 = vsel %vm4662_vm1, %v1337_v48, %v1322_v63  ;;  %vm4126_vm11 = vcmp.gt.s32.totalorder %v713_v38, 0 }
 0x2c5   : > { %v4067_v6 = vsel %vm4662_vm1, %v1334_v41, %v1335_v58  ;;  %v4071_v7 = vsel %vm4662_vm1, %v1335_v58, %v1336_v40  ;;  %v4080_v9 = vadd.f32 %v1409_v61, %v3991_v44  ;;  %v634_v44 = vadd.s32 88, %v3934_v54 }
 0x2c6   : > { %v1105_v11 = vpop.f32.mrb[16].mxu1  ;;  %v4083_v14 = vadd.f32 %v1410_v2, %v1394_v1 }
 0x2c7   : > { %v3067_v13 = vpop.f32.mrb[36].mxu0  ;;  %v1249_v15 = vrot.slane %v1105_v11, 7  ;;  %v1107_v18 = vpop.f32.mrb[17].mxu1  ;;  %v720_v47 = vand.u32 15, %v634_v44 }
 0x2c8   : > { %v1864_v60 = vrot.slane %v3067_v13, 1  ;;  %v4089_v19 = vpop.f32.mrb[37].mxu0  ;;  %v1109_v63 = vpop.f32.mrb[18].mxu1 }
 0x2c9   : > { %v4660_v23 = vrot.slane %v4089_v19, 1  ;;  %v3068_v28 = vpop.f32.mrb[38].mxu0  ;;  %v1265_v30 = vsel %vm4671_vm0, %v1248_v46, %v1249_v15  ;;  %v1250_v31 = vrot.slane %v1109_v63, 7  ;;  %v1111_v32 = vpop.f32.mrb[19].mxu1  ;;  %vm4130_vm12 = vcmp.lt.s32.totalorder %v720_v47, 15 }
 0x2ca   : > { %v1865_v33 = vrot.slane %v3068_v28, 1  ;;  %v1754_v34 = vpop.f32.mrb[39].mxu0  ;;  %v1314_v37 = vsel %vm4085_vm9, %v1265_v30, 0.0 }
 0x2cb   : > { %v1863_v39 = vrot.slane %v1754_v34, 1  ;;  %v1411_v40 = vadd.f32 %v1314_v37, %v1107_v18  ;;  %v1264_v41 = vsel %vm4671_vm0, %v1249_v15, %v1250_v31  ;;  %v727_v34 = vand.u32 15, %v635_v53 }
 0x2cc   : > { %v4108_v45 = vsel %vm4662_vm1, %v1864_v60, %v1865_v33  ;;  %v1412_v46 = vadd.f32 %v1264_v41, %v1111_v32 }
 0x2cd   : > { %v4114_v48 = vsel %vm4662_vm1, %v4660_v23, %v1863_v39  ;;  %v4118_v49 = vsel %vm4662_vm1, %v1863_v39, %v1864_v60  ;;  %v4121_v51 = vadd.f32 %v1411_v40, %v4029_v25  ;;  %v636_v25 = vadd.s32 104, %v3934_v54 }
 0x2ce   : > { %4718 = vst [vmem:[#allocation18_spill] sm:$0xff] %v4114_v48  ;;  %v4123_v27 = vadd.f32 %v1412_v46, %v1396_v42  ;;  %v1115_v52 = vpop.f32.mrb[20].mxu1  ;;  %vm4166_vm13 = vcmp.gt.s32.totalorder %v727_v34, 0  ;;  %v638_v34 = vadd.s32 120, %v3934_v54 }
 0x2cf   : > { %v3071_v58 = vpop.f32.mrb[40].mxu0  ;;  %v1251_v61 = vrot.slane %v1115_v52, 7  ;;  %v1117_v1 = vpop.f32.mrb[21].mxu1  ;;  %v734_v46 = vand.u32 15, %v636_v25 }
 0x2d0   : > { %v1868_v2 = vrot.slane %v3071_v58, 1  ;;  %v1767_v11 = vpop.f32.mrb[41].mxu0  ;;  %v1119_v12 = vpop.f32.mrb[22].mxu1  ;;  %v637_v58 = vadd.s32 112, %v3934_v54 }
 0x2d1   : > { %v1866_v15 = vrot.slane %v1767_v11, 1  ;;  %v3072_v18 = vpop.f32.mrb[42].mxu0  ;;  %v1263_v60 = vsel %vm4671_vm0, %v1250_v31, %v1251_v61  ;;  %v1252_v63 = vrot.slane %v1119_v12, 7  ;;  %v1121_v44 = vpop.f32.mrb[23].mxu1  ;;  %v1398_v31 = vsel %vm4130_vm12, %v4055_v55, 0.0 }
 0x2d2   : > { %v1869_v28 = vrot.slane %v3072_v18, 1  ;;  %v1770_v30 = vpop.f32.mrb[43].mxu0  ;;  %v1316_v32 = vsel %vm4126_vm11, %v1263_v60, 0.0  ;;  %v4723_v11 = vmov 0  ;;  %vm4170_vm14 = vcmp.lt.s32.totalorder %v734_v46, 15 }
 0x2d3   : > { %v1867_v37 = vrot.slane %v1770_v30, 1  ;;  %v4141_v38 = vsel %vm4662_vm1, %v1865_v33, %v1866_v15  ;;  %v1413_v39 = vadd.f32 %v1316_v32, %v1117_v1  ;;  %v1262_v40 = vsel %vm4671_vm0, %v1251_v61, %v1252_v63 }
 0x2d4   : > { %v4150_v41 = vsel %vm4662_vm1, %v1868_v2, %v1869_v28  ;;  %v1414_v42 = vadd.f32 %v1262_v40, %v1121_v44  ;;  %v4724_v11 = vsel %vm4166_vm13, 4294967295, %v4723_v11 }
 0x2d5   : > { %v4154_v47 = vsel %vm4662_vm1, %v1866_v15, %v1867_v37  ;;  %v4158_v33 = vsel %vm4662_vm1, %v1867_v37, %v1868_v2  ;;  %v4161_v52 = vadd.f32 %v1413_v39, %v4023_v20  ;;  %v4725_v2 = vmov 0 }
 0x2d6   : > { %v4163_v53 = vadd.f32 %v1414_v42, %v1398_v31  ;;  %v1125_v55 = vpop.f32.mrb[24].mxu1  ;;  %v4726_v2 = vsel %vm4170_vm14, 4294967295, %v4725_v2  ;;  %v741_v31 = vand.u32 15, %v637_v58 }
 0x2d7   : > { %v3075_v61 = vpop.f32.mrb[44].mxu0  ;;  %v1253_v1 = vrot.slane %v1125_v55, 7  ;;  %v1127_v12 = vpop.f32.mrb[25].mxu1 }
 0x2d8   : > { %v1872_v25 = vrot.slane %v3075_v61, 1  ;;  %v1783_v15 = vpop.f32.mrb[45].mxu0  ;;  %v1129_v18 = vpop.f32.mrb[26].mxu1  ;;  %vm4206_vm15 = vcmp.gt.s32.totalorder %v741_v31, 0 }
 0x2d9   : > { %v1870_v20 = vrot.slane %v1783_v15, 1  ;;  %v3076_v60 = vpop.f32.mrb[46].mxu0  ;;  %v1261_v44 = vsel %vm4671_vm0, %v1252_v63, %v1253_v1  ;;  %v1254_v30 = vrot.slane %v1129_v18, 7  ;;  %v1131_v32 = vpop.f32.mrb[27].mxu1  ;;  %v1400_v63 = vsel %vm4170_vm14, %v4071_v7, 0.0 }
 0x2da   : > { %v1873_v37 = vrot.slane %v3076_v60, 1  ;;  %v1786_v39 = vpop.f32.mrb[47].mxu0  ;;  %v1318_v40 = vsel %vm4166_vm13, %v1261_v44, 0.0  ;;  %v748_v60 = vand.u32 15, %v638_v34  ;;  %vm4736_vm13 = vcmp.lt.s32.totalorder %v3934_v54, 7 }
 0x2db   : > { %v1871_v42 = vrot.slane %v1786_v39, 1  ;;  %v4181_v46 = vsel %vm4662_vm1, %v1869_v28, %v1870_v20  ;;  %v1415_v55 = vadd.f32 %v1318_v40, %v1127_v12  ;;  %v1260_v61 = vsel %vm4671_vm0, %v1253_v1, %v1254_v30 }
 0x2dc   : > { %v4190_v15 = vsel %vm4662_vm1, %v1872_v25, %v1873_v37  ;;  %v1416_v18 = vadd.f32 %v1260_v61, %v1131_v32  ;;  %v643_v1 = vand.u32 15, %v3934_v54  ;;  %v4728_v32 = vmov 0 }
 0x2dd   : > { %v4194_v58 = vsel %vm4662_vm1, %v1870_v20, %v1871_v42  ;;  %v4198_v28 = vsel %vm4662_vm1, %v1871_v42, %v1872_v25  ;;  %v4201_v12 = vadd.f32 %v1415_v55, %v4067_v6  ;;  %v4729_v32 = vsel %vm4206_vm15, 4294967295, %v4728_v32 }
 0x2de   : > { %v4204_v7 = vadd.f32 %v1416_v18, %v1400_v63  ;;  %v1135_v44 = vpop.f32.mrb[28].mxu1  ;;  %4730 = vst [vmem:[#allocation20_spill] sm:$0xff] %v4729_v32  ;;  %vm4212_vm1 = vcmp.gt.s32.totalorder %v643_v1, 0  ;;  %vm4216_vm14 = vcmp.lt.s32.totalorder %v748_v60, 15  ;;  %v4733_v63 = vmov 0 }
 0x2df   : > { %v3079_v39 = vpop.f32.mrb[48].mxu0  ;;  %v1255_v40 = vrot.slane %v1135_v44, 7  ;;  %v1137_v20 = vpop.f32.mrb[29].mxu1  ;;  %v4734_v63 = vsel %vm4216_vm14, 4294967295, %v4733_v63  ;;  %v4737_v1 = vrot.slane %v3937_v56, 7 }
 0x2e0   : > { %4727 = vst [vmem:[#allocation19_spill] sm:$0xff] %v4204_v7  ;;  %v1799_v61 = vpop.f32.mrb[49].mxu0  ;;  %v1139_v23 = vpop.f32.mrb[30].mxu1  ;;  %v1876_v25 = vrot.slane %v3079_v39, 1  ;;  %4735 = vst [vmem:[#allocation21_spill] sm:$0xff] %v4734_v63 }
 0x2e1   : > { %v1874_v42 = vrot.slane %v1799_v61, 1  ;;  %v3080_v3 = vpop.f32.mrb[50].mxu0  ;;  %v1259_v6 = vsel %vm4671_vm0, %v1254_v30, %v1255_v40  ;;  %v1256_v55 = vrot.slane %v1139_v23, 7  ;;  %v1141_v31 = vpop.f32.mrb[31].mxu1 }
 0x2e2   : > { %v1802_v18 = vpop.f32.mrb[51].mxu0  ;;  %v1320_v44 = vsel %vm4206_vm15, %v1259_v6, 0.0  ;;  %v1877_v39 = vrot.slane %v3080_v3, 1  ;;  %vm4738_vm15 = vmmov %vm4736_vm13 }
 0x2e3   : > { %v1875_v61 = vrot.slane %v1802_v18, 1  ;;  %v4224_v48 = vsel %vm4736_vm13, %v1873_v37, %v1874_v42  ;;  %v1417_v30 = vadd.f32 %v1320_v44, %v1137_v20  ;;  %v1273_v23 = vsel %vm4671_vm0, %v1256_v55, %v4737_v1 }
 0x2e4   : > { %v1258_v60 = vsel %vm4671_vm0, %v1255_v40, %v1256_v55  ;;  %v1306_v7 = vsel %vm4212_vm1, %v1273_v23, 0.0  ;;  %v1402_v40 = vsel %vm4216_vm14, %v4077_v8, 0.0  ;;  %vm4740_vm0 = vmmov %vm4736_vm13  ;;  %v4742_v18 = vrot.slane %v4089_v19, 1 }
 0x2e5   : > { %v1418_v32 = vadd.f32 %v1258_v60, %v1141_v31  ;;  %v4236_v3 = vsel %vm4738_vm15, %v1874_v42, %v1875_v61  ;;  %v4240_v37 = vsel %vm4736_vm13, %v1875_v61, %v1876_v25  ;;  %v4243_v56 = vadd.f32 %v1417_v30, %v4061_v0  ;;  %vm4743_vm15 = vmmov %vm4740_vm0 }
 0x2e6   : > { %v1403_v20 = vadd.f32 %v1306_v7, %v3939_v59  ;;  %v4251_v6 = vsel %vm4740_vm0, %v1876_v25, %v1877_v39  ;;  %v4255_v42 = vpop.f32.mrb[32].mxu1  ;;  %v4263_v0 = vsel %vm4743_vm15, %v1877_v39, %v4742_v18  ;;  %vm4747_vm0 = vcmp.lt.s32.totalorder %v3934_v54, 1 }
 0x2e7   : > { %4739 = vst [vmem:[#allocation22_spill] sm:$0xff] %v4243_v56  ;;  %v4253_v55 = vadd.f32 %v1418_v32, %v1402_v40  ;;  %v4257_v31 = vpop.f32.mrb[52].mxu0  ;;  %4744 = vst [vmem:[#allocation24_spill] sm:$0xff] %v4263_v0  ;;  %v4268_v8 = vpop.f32.mrb[33].mxu1  ;;  %v4674_v61 = vrot.slane %v4255_v42, 7  ;;  %v1895_v40 = vsel %vm3949_vm2, %v4118_v49, 0.0 }
 0x2e8   : > { %v4266_v59 = vadd.f32 %v1403_v20, %v3965_v16  ;;  %v4675_v7 = vrot.slane %v4257_v31, 7  ;;  %v4271_v25 = vpop.f32.mrb[53].mxu0  ;;  %v1642_v32 = vpop.f32.mrb[34].mxu1  ;;  %vm4748_vm13 = vmmov %vm4747_vm0 }
 0x2e9   : > { %4741 = vst [vmem:[#allocation23_spill] sm:$0xff] %v4253_v55  ;;  %4746 = vst [vmem:[#allocation26_spill] sm:$0xff] %v4271_v25  ;;  %v2165_v44 = vpop.f32.mrb[54].mxu0  ;;  %v1815_v30 = vrot.slane %v1642_v32, 7  ;;  %v1644_v1 = vpop.f32.mrb[35].mxu1 }
 0x2ea   : > { %4745 = vst [vmem:[#allocation25_spill] sm:$0xff] %v4266_v59  ;;  %v2338_v19 = vrot.slane %v2165_v44, 7  ;;  %v2167_v23 = vpop.f32.mrb[55].mxu0  ;;  %vm4749_vm15 = vmmov %vm4747_vm0 }
 0x2eb   : > { %v1844_v16 = vsel %vm4747_vm0, %v4674_v61, %v1815_v30 }
 0x2ec   : > { %v2367_v39 = vsel %vm4748_vm13, %v4675_v7, %v2338_v19  ;;  %v1911_v60 = vadd.f32 %v1844_v16, %v1644_v1  ;;  %vm4750_vm13 = vmmov %vm4747_vm0 }
 0x2ed   : > { %v4282_v20 = vadd.f32 %v2367_v39, %v2167_v23 }
 0x2ee   : > { %v1927_v18 = vadd.f32 %v1911_v60, %v1895_v40  ;;  %v1648_v32 = vpop.f32.mrb[36].mxu1 }
 0x2ef   : > { %v2171_v44 = vpop.f32.mrb[56].mxu0  ;;  %v1816_v59 = vrot.slane %v1648_v32, 7  ;;  %v1650_v55 = vpop.f32.mrb[37].mxu1 }
 0x2f0   : > { %v2339_v56 = vrot.slane %v2171_v44, 7  ;;  %v2173_v63 = vpop.f32.mrb[57].mxu0  ;;  %v4288_v61 = vadd.f32 %v1927_v18, %v3970_v22  ;;  %v1652_v0 = vpop.f32.mrb[38].mxu1 }
 0x2f1   : > { %v2175_v25 = vpop.f32.mrb[58].mxu0  ;;  %v1843_v1 = vsel %vm4749_vm15, %v1815_v30, %v1816_v59  ;;  %v1817_v23 = vrot.slane %v1652_v0, 7  ;;  %v1654_v16 = vpop.f32.mrb[39].mxu1  ;;  %vm4751_vm15 = vmmov %vm4747_vm0 }
 0x2f2   : > { %v2366_v49 = vsel %vm4747_vm0, %v2338_v19, %v2339_v56  ;;  %v2340_v39 = vrot.slane %v2175_v25, 7  ;;  %v2177_v60 = vpop.f32.mrb[59].mxu0  ;;  %v1848_v40 = vsel %vm3972_vm3, %v1843_v1, 0.0  ;;  %v1897_v19 = vsel %vm3976_vm4, %v4141_v38, 0.0 }
 0x2f3   : > { %v2371_v32 = vsel %vm3972_vm3, %v2366_v49, 0.0  ;;  %v1912_v22 = vadd.f32 %v1848_v40, %v1650_v55  ;;  %v1842_v18 = vsel %vm4750_vm13, %v1816_v59, %v1817_v23  ;;  %vm4752_vm3 = vmmov %vm4747_vm0 }
 0x2f4   : > { %v4300_v44 = vadd.f32 %v2371_v32, %v2173_v63  ;;  %v2365_v0 = vsel %vm4751_vm15, %v2339_v56, %v2340_v39  ;;  %v1913_v30 = vadd.f32 %v1842_v18, %v1654_v16  ;;  %vm4753_vm13 = vmmov %vm4747_vm0 }
 0x2f5   : > { %v4304_v7 = vadd.f32 %v2365_v0, %v2177_v60  ;;  %v1928_v25 = vadd.f32 %v1912_v22, %v4108_v45  ;;  %vm4754_vm15 = vmmov %vm4747_vm0 }
 0x2f6   : > { %v1929_v24 = vadd.f32 %v1913_v30, %v1897_v19  ;;  %v1658_v1 = vpop.f32.mrb[40].mxu1 }
 0x2f7   : > { %v2181_v55 = vpop.f32.mrb[60].mxu0  ;;  %v4311_v49 = vadd.f32 %v1928_v25, %v3999_v50  ;;  %v1818_v63 = vrot.slane %v1658_v1, 7  ;;  %v1660_v59 = vpop.f32.mrb[41].mxu1 }
 0x2f8   : > { %v2341_v40 = vrot.slane %v2181_v55, 7  ;;  %v2183_v32 = vpop.f32.mrb[61].mxu0  ;;  %v4314_v56 = vadd.f32 %v1929_v24, %v4002_v36  ;;  %v1662_v16 = vpop.f32.mrb[42].mxu1 }
 0x2f9   : > { %v2185_v60 = vpop.f32.mrb[62].mxu0  ;;  %v1841_v45 = vsel %vm4752_vm3, %v1817_v23, %v1818_v63  ;;  %v1819_v22 = vrot.slane %v1662_v16, 7  ;;  %v1664_v38 = vpop.f32.mrb[43].mxu1  ;;  %v1899_v16 = vsel %vm4008_vm6, %v4158_v33, 0.0  ;;  %vm4756_vm3 = vmmov %vm4747_vm0 }
 0x2fa   : > { %v2364_v18 = vsel %vm4747_vm0, %v2340_v39, %v2341_v40  ;;  %v2342_v0 = vrot.slane %v2185_v60, 7  ;;  %v2187_v50 = vpop.f32.mrb[63].mxu0  ;;  %v1850_v30 = vsel %vm4004_vm5, %v1841_v45, 0.0 }
 0x2fb   : > { %v2373_v25 = vsel %vm4004_vm5, %v2364_v18, 0.0  ;;  %v1914_v36 = vadd.f32 %v1850_v30, %v1660_v59  ;;  %v1840_v19 = vsel %vm4753_vm13, %v1818_v63, %v1819_v22  ;;  %vm4755_vm5 = vmmov %vm4747_vm0 }
 0x2fc   : > { %v4326_v24 = vadd.f32 %v2373_v25, %v2183_v32  ;;  %v2363_v23 = vsel %vm4754_vm15, %v2341_v40, %v2342_v0  ;;  %v1915_v1 = vadd.f32 %v1840_v19, %v1664_v38  ;;  %vm4757_vm13 = vmmov %vm4747_vm0 }
 0x2fd   : > { %v4330_v55 = vadd.f32 %v2363_v23, %v2187_v50  ;;  %v1930_v39 = vadd.f32 %v1914_v36, %v4154_v47  ;;  %vm4759_vm15 = vmmov %vm4747_vm0 }
 0x2fe   : > { %v1931_v57 = vadd.f32 %v1915_v1, %v1899_v16  ;;  %v1668_v60 = vpop.f32.mrb[44].mxu1 }
 0x2ff   : > { %v2191_v59 = vpop.f32.mrb[64].mxu0  ;;  %v4337_v45 = vadd.f32 %v1930_v39, %v4035_v29  ;;  %v1820_v63 = vrot.slane %v1668_v60, 7  ;;  %v1670_v32 = vpop.f32.mrb[45].mxu1 }
 0x300   : > { %v2343_v18 = vrot.slane %v2191_v59, 7  ;;  %v2193_v30 = vpop.f32.mrb[65].mxu0  ;;  %v4340_v40 = vadd.f32 %v1931_v57, %v4039_v26  ;;  %v1672_v38 = vpop.f32.mrb[46].mxu1  ;;  %v1901_v59 = vsel %vm4045_vm8, %v4181_v46, 0.0 }
 0x301   : > { %v2195_v50 = vpop.f32.mrb[66].mxu0  ;;  %v1839_v47 = vsel %vm4755_vm5, %v1819_v22, %v1820_v63  ;;  %v1821_v25 = vrot.slane %v1672_v38, 7  ;;  %v1674_v33 = vpop.f32.mrb[47].mxu1  ;;  %vm4760_vm5 = vmmov %vm4747_vm0 }
 0x302   : > { %v2362_v36 = vsel %vm4756_vm3, %v2342_v0, %v2343_v18  ;;  %v2344_v19 = vrot.slane %v2195_v50, 7  ;;  %v2197_v29 = vpop.f32.mrb[67].mxu0  ;;  %v1852_v23 = vsel %vm4041_vm7, %v1839_v47, 0.0  ;;  %vm4761_vm3 = vmmov %vm4747_vm0 }
 0x303   : > { %v2375_v1 = vsel %vm4041_vm7, %v2362_v36, 0.0  ;;  %v1916_v26 = vadd.f32 %v1852_v23, %v1670_v32  ;;  %v1838_v39 = vsel %vm4747_vm0, %v1820_v63, %v1821_v25  ;;  %vm4758_vm7 = vmmov %vm4747_vm0 }
 0x304   : > { %v4352_v16 = vadd.f32 %v2375_v1, %v2193_v30  ;;  %v2361_v22 = vsel %vm4757_vm13, %v2343_v18, %v2344_v19  ;;  %v1917_v57 = vadd.f32 %v1838_v39, %v1674_v33  ;;  %vm4763_vm13 = vmmov %vm4747_vm0 }
 0x305   : > { %v4356_v60 = vadd.f32 %v2361_v22, %v2197_v29  ;;  %v1932_v0 = vadd.f32 %v1916_v26, %v4150_v41 }
 0x306   : > { %v1933_v35 = vadd.f32 %v1917_v57, %v1901_v59  ;;  %v1678_v38 = vpop.f32.mrb[48].mxu1 }
 0x307   : > { %v2201_v32 = vpop.f32.mrb[68].mxu0  ;;  %v4363_v50 = vadd.f32 %v1932_v0, %v4080_v9  ;;  %v1822_v63 = vrot.slane %v1678_v38, 7  ;;  %v1680_v30 = vpop.f32.mrb[49].mxu1  ;;  %v1903_v38 = vsel %vm4091_vm10, %v4198_v28, 0.0 }
 0x308   : > { %v2345_v47 = vrot.slane %v2201_v32, 7  ;;  %v2203_v36 = vpop.f32.mrb[69].mxu0  ;;  %v4366_v18 = vadd.f32 %v1933_v35, %v4083_v14  ;;  %v1682_v33 = vpop.f32.mrb[50].mxu1 }
 0x309   : > { %v2205_v29 = vpop.f32.mrb[70].mxu0  ;;  %v1837_v41 = vsel %vm4758_vm7, %v1821_v25, %v1822_v63  ;;  %v1823_v23 = vrot.slane %v1682_v33, 7  ;;  %v1684_v46 = vpop.f32.mrb[51].mxu1  ;;  %vm4764_vm7 = vmmov %vm4747_vm0 }
 0x30a   : > { %v2360_v1 = vsel %vm4759_vm15, %v2344_v19, %v2345_v47  ;;  %v2346_v26 = vrot.slane %v2205_v29, 7  ;;  %v2207_v9 = vpop.f32.mrb[71].mxu0  ;;  %v1854_v39 = vsel %vm4085_vm9, %v1837_v41, 0.0  ;;  %vm4766_vm15 = vmmov %vm4747_vm0 }
 0x30b   : > { %v2377_v22 = vsel %vm4085_vm9, %v2360_v1, 0.0  ;;  %v1918_v14 = vadd.f32 %v1854_v39, %v1680_v30  ;;  %v1836_v57 = vsel %vm4760_vm5, %v1822_v63, %v1823_v23  ;;  %vm4762_vm9 = vmmov %vm4747_vm0  ;;  %vm4767_vm5 = vnez %v4724_v11 }
 0x30c   : > { %v4378_v0 = vadd.f32 %v2377_v22, %v2203_v36  ;;  %v2359_v25 = vsel %vm4761_vm3, %v2345_v47, %v2346_v26  ;;  %v1919_v59 = vadd.f32 %v1836_v57, %v1684_v46  ;;  %vm4768_vm3 = vmmov %vm4747_vm0 }
 0x30d   : > { %v4382_v35 = vadd.f32 %v2359_v25, %v2207_v9  ;;  %v1934_v19 = vadd.f32 %v1918_v14, %v4194_v58 }
 0x30e   : > { %v1935_v17 = vadd.f32 %v1919_v59, %v1903_v38  ;;  %v1688_v32 = vpop.f32.mrb[52].mxu1 }
 0x30f   : > { %v2211_v30 = vpop.f32.mrb[72].mxu0  ;;  %v4389_v33 = vadd.f32 %v1934_v19, %v4121_v51  ;;  %v1824_v63 = vrot.slane %v1688_v32, 7  ;;  %v1690_v36 = vpop.f32.mrb[53].mxu1 }
 0x310   : > { %v2347_v29 = vrot.slane %v2211_v30, 7  ;;  %v2213_v41 = vpop.f32.mrb[73].mxu0  ;;  %v4392_v47 = vadd.f32 %v1935_v17, %v4123_v27  ;;  %v1692_v46 = vpop.f32.mrb[54].mxu1  ;;  %v1905_v17 = vsel %vm4130_vm12, %v4224_v48, 0.0 }
 0x311   : > { %v2215_v1 = vpop.f32.mrb[74].mxu0  ;;  %v1835_v58 = vsel %vm4762_vm9, %v1823_v23, %v1824_v63  ;;  %v1825_v9 = vrot.slane %v1692_v46, 7  ;;  %v1694_v28 = vpop.f32.mrb[55].mxu1  ;;  %vm4769_vm9 = vmmov %vm4747_vm0 }
 0x312   : > { %v2358_v39 = vsel %vm4747_vm0, %v2346_v26, %v2347_v29  ;;  %v2348_v22 = vrot.slane %v2215_v1, 7  ;;  %v2217_v51 = vpop.f32.mrb[75].mxu0  ;;  %v1856_v14 = vsel %vm4126_vm11, %v1835_v58, 0.0 }
 0x313   : > { %v2379_v57 = vsel %vm4126_vm11, %v2358_v39, 0.0  ;;  %v1920_v27 = vadd.f32 %v1856_v14, %v1690_v36  ;;  %v1834_v25 = vsel %vm4763_vm13, %v1824_v63, %v1825_v9  ;;  %vm4765_vm11 = vmmov %vm4747_vm0  ;;  %vm4770_vm0 = vnez %v4726_v2 }
 0x314   : > { %v4404_v59 = vadd.f32 %v2379_v57, %v2213_v41  ;;  %v2357_v23 = vsel %vm4764_vm7, %v2347_v29, %v2348_v22  ;;  %v1921_v19 = vadd.f32 %v1834_v25, %v1694_v28  ;;  %vm4772_vm13 = vmmov %vm4768_vm3 }
 0x315   : > { %v4408_v38 = vadd.f32 %v2357_v23, %v2217_v51  ;;  %v1936_v26 = vadd.f32 %v1920_v27, %v4190_v15  ;;  %vm4773_vm7 = vmmov %vm4768_vm3 }
 0x316   : > { %v1937_v62 = vadd.f32 %v1921_v19, %v1905_v17  ;;  %v1698_v32 = vpop.f32.mrb[56].mxu1  ;;  %v1907_v17 = vsel %vm4770_vm0, %v4240_v37, 0.0 }
 0x317   : > { %v2221_v30 = vpop.f32.mrb[76].mxu0  ;;  %v4415_v36 = vadd.f32 %v1936_v26, %v4161_v52  ;;  %v1826_v63 = vrot.slane %v1698_v32, 7  ;;  %v1700_v41 = vpop.f32.mrb[57].mxu1 }
 0x318   : > { %v2349_v46 = vrot.slane %v2221_v30, 7  ;;  %v2223_v1 = vpop.f32.mrb[77].mxu0  ;;  %v4418_v29 = vadd.f32 %v1937_v62, %v4163_v53  ;;  %v1702_v58 = vpop.f32.mrb[58].mxu1 }
 0x319   : > { %v2225_v28 = vpop.f32.mrb[78].mxu0  ;;  %v1833_v15 = vsel %vm4765_vm11, %v1825_v9, %v1826_v63  ;;  %v1827_v39 = vrot.slane %v1702_v58, 7  ;;  %v1704_v48 = vpop.f32.mrb[59].mxu1 }
 0x31a   : > { %v2356_v51 = vsel %vm4766_vm15, %v2348_v22, %v2349_v46  ;;  %v2350_v14 = vrot.slane %v2225_v28, 7  ;;  %v2227_v52 = vpop.f32.mrb[79].mxu0  ;;  %v1858_v57 = vsel %vm4767_vm5, %v1833_v15, 0.0  ;;  %vm4777_vm15 = vmmov %vm4768_vm3 }
 0x31b   : > { %v2381_v27 = vsel %vm4767_vm5, %v2356_v51, 0.0  ;;  %v1922_v53 = vadd.f32 %v1858_v57, %v1700_v41  ;;  %v1832_v25 = vsel %vm4768_vm3, %v1826_v63, %v1827_v39  ;;  %vm4779_vm5 = vmmov %vm4768_vm3 }
 0x31c   : > { %v4430_v23 = vadd.f32 %v2381_v27, %v2223_v1  ;;  %v2355_v9 = vsel %vm4769_vm9, %v2349_v46, %v2350_v14  ;;  %v1923_v19 = vadd.f32 %v1832_v25, %v1704_v48  ;;  %v4771_v46 = vld [vmem:[#allocation19_spill] sm:$0xff]  ;;  %v4774_v27 = vld [vmem:[#allocation20_spill] sm:$0xff]  ;;  %vm4780_vm9 = vmmov %vm4768_vm3 }
 0x31d   : > { %v4434_v26 = vadd.f32 %v2355_v9, %v2227_v52  ;;  %v1938_v22 = vadd.f32 %v1922_v53, %v4236_v3  ;;  %vm4775_vm11 = vnez %v4774_v27 }
 0x31e   : > { %v1939_v11 = vadd.f32 %v1923_v19, %v1907_v17  ;;  %v1708_v62 = vpop.f32.mrb[60].mxu1 }
 0x31f   : > { %v2231_v32 = vpop.f32.mrb[80].mxu0  ;;  %v4441_v30 = vadd.f32 %v1938_v22, %v4201_v12  ;;  %v1828_v63 = vrot.slane %v1708_v62, 7  ;;  %v1710_v1 = vpop.f32.mrb[61].mxu1  ;;  %v4776_v22 = vrot.slane %v4255_v42, 7 }
 0x320   : > { %v2351_v41 = vrot.slane %v2231_v32, 7  ;;  %v2233_v58 = vpop.f32.mrb[81].mxu0  ;;  %v4444_v28 = vadd.f32 %v1939_v11, %v4771_v46  ;;  %v1712_v15 = vpop.f32.mrb[62].mxu1 }
 0x321   : > { %v2235_v48 = vpop.f32.mrb[82].mxu0  ;;  %v1831_v3 = vsel %vm4772_vm13, %v1827_v39, %v1828_v63  ;;  %v1829_v51 = vrot.slane %v1712_v15, 7  ;;  %v1714_v57 = vpop.f32.mrb[63].mxu1 }
 0x322   : > { %v2354_v37 = vsel %vm4773_vm7, %v2350_v14, %v2351_v41  ;;  %v2352_v52 = vrot.slane %v2235_v48, 7  ;;  %v2237_v12 = vpop.f32.mrb[83].mxu0  ;;  %v1860_v53 = vsel %vm4775_vm11, %v1831_v3, 0.0  ;;  %v4778_v14 = vrot.slane %v4257_v31, 7  ;;  %v4781_v31 = vld [vmem:[#allocation26_spill] sm:$0xff]  ;;  %v4782_v48 = vld [vmem:[#allocation24_spill] sm:$0xff] }
 0x323   : > { %v2383_v25 = vsel %vm4775_vm11, %v2354_v37, 0.0  ;;  %v1924_v9 = vadd.f32 %v1860_v53, %v1710_v1  ;;  %v1845_v39 = vsel %vm4777_vm15, %v1829_v51, %v4776_v22  ;;  %v1830_v32 = vsel %vm4768_vm3, %v1828_v63, %v1829_v51  ;;  %v4784_v53 = vld [vmem:[#allocation22_spill] sm:$0xff] }
 0x324   : > { %v4454_v19 = vadd.f32 %v2383_v25, %v2233_v58  ;;  %v2368_v17 = vsel %vm4779_vm5, %v2352_v52, %v4778_v14  ;;  %v1846_v11 = vsel %vm4212_vm1, %v1845_v39, 0.0  ;;  %v2353_v42 = vsel %vm4780_vm9, %v2351_v41, %v2352_v52  ;;  %v4785_v63 = vld [vmem:[#allocation18_spill] sm:$0xff]  ;;  %v4787_v39 = vld [vmem:[#allocation25_spill] sm:$0xff] }
 0x325   : > { %v2369_v62 = vsel %vm4212_vm1, %v2368_v17, 0.0  ;;  %v1940_v1 = vadd.f32 %v1924_v9, %v4251_v6  ;;  %v1910_v58 = vadd.f32 %v1846_v11, %v4268_v8  ;;  %v1925_v15 = vadd.f32 %v1830_v32, %v1714_v57  ;;  %v4786_v8 = vld [vmem:[#allocation23_spill] sm:$0xff] }
 0x326   : > { %v2433_v46 = vadd.f32 %v2369_v62, %v4781_v31  ;;  %v1909_v37 = vsel %vm4216_vm14, %v4782_v48, 0.0  ;;  %v3099_v27 = vpop.f32.mrb[64].mxu1  ;;  %v4478_v34 = vadd.f32 %v2353_v42, %v2237_v12  ;;  %vm4788_vm1 = vcmp.lt.s32.totalorder %v3934_v54, 7 }
 0x327   : > { %v4481_v25 = vadd.f32 %v1940_v1, %v4784_v53  ;;  %v1926_v51 = vadd.f32 %v1910_v58, %v4785_v63  ;;  %v1941_v41 = vadd.f32 %v1925_v15, %v1909_v37  ;;  %v4484_v52 = vpop.f32.mrb[65].mxu1  ;;  %v2387_v57 = vrot.slane %v3099_v27, 1  ;;  %vm4789_vm13 = vmmov %vm4788_vm1 }
 0x328   : > { %v3100_v6 = vpop.f32.mrb[66].mxu1  ;;  %v2385_v12 = vrot.slane %v4484_v52, 1  ;;  %vm4790_vm7 = vmmov %vm4788_vm1 }
 0x329   : > { %v4487_v9 = vadd.f32 %v1941_v41, %v4786_v8  ;;  %v2388_v22 = vrot.slane %v3100_v6, 1  ;;  %v1942_v14 = vadd.f32 %v1926_v51, %v4787_v39  ;;  %v2277_v17 = vpop.f32.mrb[67].mxu1  ;;  %vm4791_vm11 = vmmov %vm4788_vm1 }
 0x32a   : > { %v2386_v11 = vrot.slane %v2277_v17, 1  ;;  %vm4793_vm15 = vmmov %vm4788_vm1 }
 0x32b   : > { %v2413_v62 = vsel %vm4788_vm1, %v2387_v57, %v2388_v22  ;;  %vm4794_vm5 = vmmov %vm4788_vm1 }
 0x32c   : > { %v2451_v32 = vadd.f32 %v4300_v44, %v2413_v62  ;;  %v2414_v42 = vsel %vm4789_vm13, %v2386_v11, %v2387_v57  ;;  %v2415_v1 = vsel %vm4790_vm7, %v2385_v12, %v2386_v11  ;;  %vm4797_vm3 = vmmov %vm4788_vm1 }
 0x32d   : > { %v2418_v58 = vsel %vm3949_vm2, %v2414_v42, 0.0  ;;  %v2449_v31 = vadd.f32 %v2433_v46, %v2415_v1  ;;  %vm4792_vm2 = vmmov %vm4788_vm1 }
 0x32e   : > { %v2467_v15 = vadd.f32 %v2451_v32, %v4311_v49  ;;  %v2450_v48 = vadd.f32 %v4282_v20, %v2418_v58  ;;  %v3103_v37 = vpop.f32.mrb[68].mxu1  ;;  %vm4798_vm9 = vmmov %vm4788_vm1 }
 0x32f   : > { %v2465_v27 = vadd.f32 %v2449_v31, %v1942_v14  ;;  %v2290_v44 = vpop.f32.mrb[69].mxu1  ;;  %v2391_v41 = vrot.slane %v3103_v37, 1  ;;  %vm4802_vm13 = vmmov %vm4788_vm1 }
 0x330   : > { %v2466_v53 = vadd.f32 %v2450_v48, %v4288_v61  ;;  %v2389_v63 = vrot.slane %v2290_v44, 1  ;;  %v3104_v51 = vpop.f32.mrb[70].mxu1 }
 0x331   : > { %v2392_v6 = vrot.slane %v3104_v51, 1  ;;  %v2293_v8 = vpop.f32.mrb[71].mxu1 }
 0x332   : > { %v2862_v57 = vpack.c.bf16 %v2466_v53, %v2465_v27  ;;  %v2412_v10 = vsel %vm4791_vm11, %v2388_v22, %v2389_v63  ;;  %v2390_v46 = vrot.slane %v2293_v8, 1 }
 0x333   : > { %v2420_v49 = vsel %vm3976_vm4, %v2412_v10, 0.0  ;;  %v2409_v20 = vsel %vm4792_vm2, %v2391_v41, %v2392_v6  ;;  %vm4795_vm4 = vmmov %vm4788_vm1 }
 0x334   : > { %2863 = vst [vmem:[%s3846_s27] sm:$0xff] %v2862_v57   ;;  %v2452_v39 = vadd.f32 %v4304_v7, %v2420_v49  ;;  %v2455_v61 = vadd.f32 %v4352_v16, %v2409_v20  ;;  %v2410_v14 = vsel %vm4793_vm15, %v2390_v46, %v2391_v41  ;;  %v2411_v17 = vsel %vm4794_vm5, %v2389_v63, %v2390_v46 }
 0x335   : > { %v2422_v22 = vsel %vm4008_vm6, %v2410_v14, 0.0  ;;  %v2453_v5 = vadd.f32 %v4326_v24, %v2411_v17  ;;  %vm4796_vm6 = vmmov %vm4788_vm1 }
 0x336   : > { %v2468_v11 = vadd.f32 %v2452_v39, %v4314_v56  ;;  %v2471_v62 = vadd.f32 %v2455_v61, %v4363_v50  ;;  %v2454_v7 = vadd.f32 %v4330_v55, %v2422_v22  ;;  %v3107_v32 = vpop.f32.mrb[72].mxu1 }
 0x337   : > { %v2469_v16 = vadd.f32 %v2453_v5, %v4337_v45  ;;  %v2306_v42 = vpop.f32.mrb[73].mxu1  ;;  %v2395_v48 = vrot.slane %v3107_v32, 1 }
 0x338   : > { %v2867_v1 = vpack.c.bf16 %v2468_v11, %v2467_v15  ;;  %v2470_v58 = vadd.f32 %v2454_v7, %v4340_v40  ;;  %v2393_v31 = vrot.slane %v2306_v42, 1  ;;  %v3108_v4 = vpop.f32.mrb[74].mxu1 }
 0x339   : > { %v2396_v37 = vrot.slane %v3108_v4, 1  ;;  %v2309_v27 = vpop.f32.mrb[75].mxu1 }
 0x33a   : > { %2908 = vst [vmem:[%s3846_s27 + $0x8] sm:$0xff] %v2867_v1   ;;  %v2872_v24 = vpack.c.bf16 %v2470_v58, %v2469_v16  ;;  %v2408_v56 = vsel %vm4795_vm4, %v2392_v6, %v2393_v31  ;;  %v2394_v50 = vrot.slane %v2309_v27, 1 }
 0x33b   : > { %v2424_v55 = vsel %vm4045_vm8, %v2408_v56, 0.0  ;;  %v2405_v45 = vsel %vm4796_vm6, %v2395_v48, %v2396_v37  ;;  %vm4799_vm8 = vmmov %vm4788_vm1 }
 0x33c   : > { %2909 = vst [vmem:[%s3846_s27 + $0x10] sm:$0xff] %v2872_v24   ;;  %v2456_v40 = vadd.f32 %v4356_v60, %v2424_v55  ;;  %v2459_v15 = vadd.f32 %v4404_v59, %v2405_v45  ;;  %v2406_v44 = vsel %vm4797_vm3, %v2394_v50, %v2395_v48  ;;  %v2407_v53 = vsel %vm4798_vm9, %v2393_v31, %v2394_v50 }
 0x33d   : > { %v2426_v43 = vsel %vm4091_vm10, %v2406_v44, 0.0  ;;  %v2457_v63 = vadd.f32 %v4378_v0, %v2407_v53  ;;  %vm4800_vm10 = vmmov %vm4788_vm1 }
 0x33e   : > { %v2472_v51 = vadd.f32 %v2456_v40, %v4366_v18  ;;  %v2475_v60 = vadd.f32 %v2459_v15, %v4415_v36  ;;  %v2458_v41 = vadd.f32 %v4382_v35, %v2426_v43  ;;  %v3111_v59 = vpop.f32.mrb[76].mxu1 }
 0x33f   : > { %v2473_v6 = vadd.f32 %v2457_v63, %v4389_v33  ;;  %v2322_v8 = vpop.f32.mrb[77].mxu1  ;;  %v2399_v0 = vrot.slane %v3111_v59, 1 }
 0x340   : > { %v2877_v57 = vpack.c.bf16 %v2472_v51, %v2471_v62  ;;  %v2474_v10 = vadd.f32 %v2458_v41, %v4392_v47  ;;  %v2397_v46 = vrot.slane %v2322_v8, 1  ;;  %v3112_v21 = vpop.f32.mrb[78].mxu1 }
 0x341   : > { %v2400_v49 = vrot.slane %v3112_v21, 1  ;;  %v2325_v20 = vpop.f32.mrb[79].mxu1 }
 0x342   : > { %2910 = vst [vmem:[%s3846_s27 + $0x18] sm:$0xff] %v2877_v57   ;;  %v2882_v18 = vpack.c.bf16 %v2474_v10, %v2473_v6  ;;  %v2404_v35 = vsel %vm4799_vm8, %v2396_v37, %v2397_v46  ;;  %v2398_v36 = vrot.slane %v2325_v20, 1 }
 0x343   : > { %v2428_v33 = vsel %vm4130_vm12, %v2404_v35, 0.0  ;;  %v2401_v47 = vsel %vm4800_vm10, %v2399_v0, %v2400_v49  ;;  %v2416_v39 = vsel %vm4788_vm1, %v2400_v49, %v2385_v12  ;;  %vm4801_vm12 = vmmov %vm4788_vm1 }
 0x344   : > { %2911 = vst [vmem:[%s3846_s27 + $0x20] sm:$0xff] %v2882_v18   ;;  %v2460_v61 = vadd.f32 %v4408_v38, %v2428_v33  ;;  %v2432_v14 = vsel %vm4216_vm14, %v2416_v39, 0.0  ;;  %v2463_v17 = vadd.f32 %v4454_v19, %v2401_v47  ;;  %v2402_v13 = vsel %vm4801_vm12, %v2398_v36, %v2399_v0 }
 0x345   : > { %v2464_v22 = vadd.f32 %v4478_v34, %v2432_v14  ;;  %v2403_v52 = vsel %vm4802_vm13, %v2397_v46, %v2398_v36  ;;  %v2430_v12 = vsel %vm4770_vm0, %v2402_v13, 0.0 }
 0x346   : > { %v2476_v38 = vadd.f32 %v2460_v61, %v4418_v29  ;;  %v2479_v3 = vadd.f32 %v2463_v17, %v4481_v25  ;;  %v2461_v19 = vadd.f32 %v4430_v23, %v2403_v52  ;;  %v2462_v5 = vadd.f32 %v4434_v26, %v2430_v12 }
 0x347   : > { %v2480_v54 = vadd.f32 %v2464_v22, %v4487_v9 }
 0x348   : > { %v2887_v34 = vpack.c.bf16 %v2476_v38, %v2475_v60  ;;  %v2477_v2 = vadd.f32 %v2461_v19, %v4441_v30  ;;  %v2478_v11 = vadd.f32 %v2462_v5, %v4444_v28 }
 0x349   : > { %v2897_v62 = vpack.c.bf16 %v2480_v54, %v2479_v3 }
 0x34a   : > { %2912 = vst [vmem:[%s3846_s27 + $0x28] sm:$0xff] %v2887_v34   ;;  %v2892_v29 = vpack.c.bf16 %v2478_v11, %v2477_v2 }
 0x34b   : > { %2914 = vst [vmem:[%s3846_s27 + $0x38] sm:$0xff] %v2897_v62  }
 0x34c   : > { %2913 = vst [vmem:[%s3846_s27 + $0x30] sm:$0xff] %v2892_v29  }
 0x34d   : > { %3428 = shalt.err (!%p3425_p1)
}
 0x34e   : > { %s3429_s23 = scalar_lea.hbm %s4584_s18, 1024  ;;  %s3433_s13 = scalar_lea.hbm %s4648_s5, 4096 }
 0x34f   : > { %p3430_p2 = scmp.ne.s32.totalorder %s4584_s18, %s3429_s23  ;;  %p3434_p0 = scmp.lt.u32.totalorder %s4584_s18, %s4648_s5 }
 0x350   : > { %p3435_p4 = scmp.lt.u32.totalorder %s3433_s13, %s3429_s23  ;;  %p3437_p6 = scmp.lt.u32.totalorder %s3429_s23, %s4584_s18 }
 0x351   : > { %p3431_p5 = pnand %p3430_p2, %p3707_p8 }
 0x352   : > { %p3436_p10 = por %p3435_p4, %p3434_p0 }
 0x353   : > { %p3432_p9 = pneg %p3431_p5 }
 0x354   : > { %p3438_p11 = por %p3437_p6, %p3436_p10 }
 0x356   : > { %p3439_p13 = pnand %p3438_p11, %p3432_p9 }
 0x358   : > { %3442 = shalt.err (!%p3439_p13)
}
 0x359   : > { %s3530_s27 = smov 64   ;;  %s3531_s11 = smov 4  }
 0x35a   : > { %3127 = dma.vmem_to_hbm [thread:$0]  (%p3707_p8), %s4586_s17, 1024, %s4584_s18, %s2562_s6, %s3530_s27, %s3530_s27, %s3531_s11  }
 0x35b PF: > { %s4803_s16 = sld [smem:[#allocation13_spill]]  ;;  %s4804_s21 = sld [smem:[#allocation15_spill]] }
 0x35c   : > { %p3149_p3 = scmp.ge.s32.totalorder %s3517_s25, 2 }
 0x361   : > { %s2592_s22 = sand.u32 1, %s4803_s16   ;;  %p4805_p7 = scmp.ne.s32.totalorder %s4804_s21, 0 }
 0x362   : > { %s2593_s8 = scalar_lea.sflag [#allocation5], %s2592_s22 }
 0x363   : > { %p3141_p12 = pnand %p3149_p3, %p4805_p7 }
 0x365   : > { %3484 = dma.done.wait (!%p3141_p12), %s2593_s8, 1024  }
 0x366   : > { %3486 = vsyncadd (!%p3141_p12), %s2593_s8, 4294966272  ;;  %s22_s25 = sadd.s32 1, %s3517_s25   ;;  %s4806_s21 = sld [smem:[#allocation14_spill]] }
 0x367   : > { %p19_p1 = scmp.ge.s32.totalorder %s22_s25, 6   ;;  %s4807_s23 = sld [smem:[#allocation16_spill]] }
 0x368   : > { %s4808_s12 = sld [smem:[#allocation17_spill]]  ;;  %s4809_s18 = smov %s3493_s19 }
 0x369   : > { %s4810_s19 = smov %s3497_s20  ;;  %s4811_s20 = smov %s3726_s2 }
 0x36a   : > { %s4812_s22 = smov %s3513_s24  ;;  %21 = sbr.rel (!%p19_p1) target bundleno = 11 (0xb), region = 103 }
 0x36e   : > { %s4813_s24 = smov %s4808_s12 }
 0x371   :  { %2598 = vsyncpa [#allocation4], 1 }
 0x372   :  { %2600 = vsyncpa [#allocation4 + $0x1], 1 }
 0x373   :  { %2601 = vsyncpa [#allocation7], 1 }
 0x374   :  { %2602 = vsyncpa [#allocation5], 1 }
 0x375   :  { %2604 = vsyncpa [#allocation5 + $0x1], 1 }

</bundles_post_ra>
